<compile_context>
chip_gen: v7x
topology: tpu7x:2x2x1
jax: 0.10.0
libtpu: 0.0.40
codegen_flags: <defaults>
</compile_context>

<pallas_src>
import jax
import jax.numpy as jnp
from jax.experimental import pallas as pl
from jax.experimental.pallas import tpu as pltpu

IMAGE_SIZE = 784
FIRST_LAYER = 100
SECOND_LAYER = 50
LABELS = 10

# Lane-padded sizes (multiples of 128).
H0_PAD = 128   # FIRST_LAYER  padded 100 -> 128
H1_PAD = 128   # SECOND_LAYER padded  50 -> 128
OUT_PAD = 128  # LABELS       padded  10 -> 128

TM_MAX = 1024  # largest batch tile (multiple of 256: fills v6e/v7x 2x256^2 MXU)
TM_MIN = 256   # smallest batch tile we bother with

_NEG_BIG = -1.0e30  # finite "-inf" for masked pad logits


def mlp_kernel(x_ref, w0_ref, b0_ref, w1_ref, b1_ref, w2_ref, b2_ref, o_ref):
    x = x_ref[...]                                                  # (TM, 784) bf16
    # fc0 + relu (f32 accumulate on the MXU, bf16 feed to the next matmul)
    h0 = jnp.dot(x, w0_ref[...], preferred_element_type=jnp.float32) + b0_ref[...]
    h0 = jnp.maximum(h0, 0.0).astype(jnp.bfloat16)                  # (TM, 128)
    # fc1 + relu
    h1 = jnp.dot(h0, w1_ref[...], preferred_element_type=jnp.float32) + b1_ref[...]
    h1 = jnp.maximum(h1, 0.0).astype(jnp.bfloat16)                  # (TM, 128)
    # fc2 -> padded logits (TM, 128); pad columns masked before softmax
    logits = jnp.dot(h1, w2_ref[...], preferred_element_type=jnp.float32) + b2_ref[...]
    col = jax.lax.broadcasted_iota(jnp.int32, logits.shape, dimension=1)
    logits = jnp.where(col < LABELS, logits, _NEG_BIG)
    # log_softmax along the last dim (exp of the masked pad columns underflows to 0)
    m = jnp.max(logits, axis=-1, keepdims=True)
    s = logits - m
    lse = jnp.log(jnp.sum(jnp.exp(s), axis=-1, keepdims=True))
    o_ref[...] = (s - lse).astype(o_ref.dtype)


def prepare_params(w0, b0, w1, b1, w2, b2):
    """One-time parameter staging: zero-pad to 128-lane multiples + bf16 cast.

    Zero padding is exact: zero weight columns + zero bias -> zero activations
    through ReLU; zero weight rows contribute nothing to the next layer.
    Hoisted out of the per-call path per the performance review.
    """
    w0_p = jnp.zeros((IMAGE_SIZE, H0_PAD), jnp.float32).at[:, :FIRST_LAYER].set(w0)
    b0_p = jnp.zeros((1, H0_PAD), jnp.float32).at[0, :FIRST_LAYER].set(b0)
    w1_p = jnp.zeros((H0_PAD, H1_PAD), jnp.float32).at[:FIRST_LAYER, :SECOND_LAYER].set(w1)
    b1_p = jnp.zeros((1, H1_PAD), jnp.float32).at[0, :SECOND_LAYER].set(b1)
    w2_p = jnp.zeros((H1_PAD, OUT_PAD), jnp.float32).at[:SECOND_LAYER, :LABELS].set(w2)
    b2_p = jnp.zeros((1, OUT_PAD), jnp.float32).at[0, :LABELS].set(b2)
    return (w0_p.astype(jnp.bfloat16), b0_p,
            w1_p.astype(jnp.bfloat16), b1_p,
            w2_p.astype(jnp.bfloat16), b2_p)


def _pick_tm(batch):
    """Biggest tile that amortizes per-step overhead while keeping >=2 grid
    steps (v7x has 2 TensorCores) whenever the batch is large enough."""
    tm = TM_MAX
    while tm > TM_MIN and pl.cdiv(batch, tm) < 2:
        tm //= 2
    return tm


def model_a_forward(x, prepared_params, *, tm=None, out_dtype=jnp.float32):
    w0_p, b0_p, w1_p, b1_p, w2_p, b2_p = prepared_params

    # Mirror x.view(-1, IMAGE_SIZE); cast to bf16 BEFORE padding (no f32
    # intermediate), pad only when the batch is not a tile multiple.
    x2d = x.reshape(-1, IMAGE_SIZE).astype(jnp.bfloat16)
    B = x2d.shape[0]
    if tm is None:
        tm = _pick_tm(B)
    n_tiles = pl.cdiv(B, tm)
    Bp = n_tiles * tm
    if Bp != B:
        x2d = jnp.pad(x2d, ((0, Bp - B), (0, 0)))   # pad rows sliced away below

    out_padded = pl.pallas_call(
        mlp_kernel,
        out_shape=jax.ShapeDtypeStruct((Bp, OUT_PAD), out_dtype),
        grid_spec=pl.GridSpec(
            grid=(n_tiles,),
            in_specs=[
                # x: batch-tiled, double-buffered by the BlockSpec pipeline.
                pl.BlockSpec((tm, IMAGE_SIZE), lambda i: (i, 0)),
                # Weights / biases: constant index_map -> VMEM-resident, no re-DMA.
                pl.BlockSpec((IMAGE_SIZE, H0_PAD), lambda i: (0, 0)),
                pl.BlockSpec((1, H0_PAD), lambda i: (0, 0)),
                pl.BlockSpec((H0_PAD, H1_PAD), lambda i: (0, 0)),
                pl.BlockSpec((1, H1_PAD), lambda i: (0, 0)),
                pl.BlockSpec((H1_PAD, OUT_PAD), lambda i: (0, 0)),
                pl.BlockSpec((1, OUT_PAD), lambda i: (0, 0)),
            ],
            out_specs=pl.BlockSpec((tm, OUT_PAD), lambda i: (i, 0)),
        ),
        compiler_params=pltpu.CompilerParams(
            # Batch axis shards across both TCs on v7x; harmless on v5e/v6e.
            dimension_semantics=("parallel",),
        ),
    )(x2d, w0_p, b0_p, w1_p, b1_p, w2_p, b2_p)

    # Strip batch padding and the 118 pad label columns (layout plumbing).
    return out_padded[:B, :LABELS]


def init_params(key):
    # Deterministic init (shapes match nn.Linear layers; values are synthetic).
    # Weights stored as (in, out) so y = x @ W + b  (== PyTorch x @ W.T + b).
    k0, k1, k2, k3, k4, k5 = jax.random.split(key, 6)
    w0 = jax.random.normal(k0, (IMAGE_SIZE, FIRST_LAYER), jnp.float32) * 0.05
    b0 = jax.random.normal(k1, (FIRST_LAYER,), jnp.float32) * 0.05
    w1 = jax.random.normal(k2, (FIRST_LAYER, SECOND_LAYER), jnp.float32) * 0.05
    b1 = jax.random.normal(k3, (SECOND_LAYER,), jnp.float32) * 0.05
    w2 = jax.random.normal(k4, (SECOND_LAYER, LABELS), jnp.float32) * 0.05
    b2 = jax.random.normal(k5, (LABELS,), jnp.float32) * 0.05
    return w0, b0, w1, b1, w2, b2


def reference_forward_bf16(x, w0, b0, w1, b1, w2, b2):
    # Mirrors the kernel's numerics: bf16 matmul operands, f32 accumulation.
    x2d = x.reshape(-1, IMAGE_SIZE).astype(jnp.bfloat16)
    h0 = jnp.dot(x2d, w0.astype(jnp.bfloat16),
                 preferred_element_type=jnp.float32) + b0
    h0 = jax.nn.relu(h0).astype(jnp.bfloat16)
    h1 = jnp.dot(h0, w1.astype(jnp.bfloat16),
                 preferred_element_type=jnp.float32) + b1
    h1 = jax.nn.relu(h1).astype(jnp.bfloat16)
    logits = jnp.dot(h1, w2.astype(jnp.bfloat16),
                     preferred_element_type=jnp.float32) + b2
    return jax.nn.log_softmax(logits, axis=-1)


def reference_forward_f32(x, w0, b0, w1, b1, w2, b2):
    x2d = x.reshape(-1, IMAGE_SIZE).astype(jnp.float32)
    h0 = jax.nn.relu(x2d @ w0 + b0)
    h1 = jax.nn.relu(h0 @ w1 + b1)
    return jax.nn.log_softmax(h1 @ w2 + b2, axis=-1)


if __name__ == "__main__":
    key = jax.random.PRNGKey(0)
    kx, kp = jax.random.split(key)
    # Small MNIST-like batch (B=200: exercises batch padding inside one tile).
    B = 200
    x = jax.random.normal(kx, (B, 1, 28, 28), jnp.float32)
    params = init_params(kp)
    prepared = prepare_params(*params)   # padded + bf16, done ONCE (not per call)

    out = model_a_forward(x, prepared)
    out = jax.block_until_ready(out)
    assert out.shape == (B, LABELS)

    # Exact-numerics check against a bf16-mirrored reference.
    ref_bf16 = reference_forward_bf16(x, *params)
    assert jnp.allclose(out, ref_bf16, atol=2e-3, rtol=2e-3)

    # Semantics check against the pure-f32 PyTorch-equivalent forward
    # (loose tolerance covers bf16 weight/activation quantization).
    ref_f32 = reference_forward_f32(x, *params)
    assert jnp.allclose(out, ref_f32, atol=5e-2, rtol=5e-2)

    # Exercise the multi-tile "parallel" grid path as well (B > TM_MIN).
    B2 = 600
    x2 = jax.random.normal(kx, (B2, 1, 28, 28), jnp.float32)
    out2 = jax.block_until_ready(model_a_forward(x2, prepared))
    assert out2.shape == (B2, LABELS)
    assert jnp.allclose(out2, reference_forward_f32(x2, *params),
                        atol=5e-2, rtol=5e-2)

    print("KERNEL_OK")
</pallas_src>

<mosaic_0001>
module attributes {stable_mosaic.version = 11 : i64} {
  func.func @mlp_kernel(%arg0: i32, %arg1: memref<256x784xbf16, #tpu.memory_space<vmem>>, %arg2: memref<784x128xbf16, #tpu.memory_space<vmem>>, %arg3: memref<1x128xf32, #tpu.memory_space<vmem>>, %arg4: memref<128x128xbf16, #tpu.memory_space<vmem>>, %arg5: memref<1x128xf32, #tpu.memory_space<vmem>>, %arg6: memref<128x128xbf16, #tpu.memory_space<vmem>>, %arg7: memref<1x128xf32, #tpu.memory_space<vmem>>, %arg8: memref<256x128xf32, #tpu.memory_space<vmem>>) attributes {dimension_semantics = [#tpu.dimension_semantics<parallel>], iteration_bounds = array<i64: 1>, scalar_prefetch = 0 : i64, scratch_operands = 0 : i64, tpu.core_type = #tpu.core_type<tc>, window_params = [{transform_indices = @transform_0, window_bounds = array<i64: 256, 784>}, {pipeline_mode = #tpu.pipeline_mode<synchronous>, transform_indices = @transform_1, window_bounds = array<i64: 784, 128>}, {pipeline_mode = #tpu.pipeline_mode<synchronous>, transform_indices = @transform_2, window_bounds = array<i64: 1, 128>}, {pipeline_mode = #tpu.pipeline_mode<synchronous>, transform_indices = @transform_3, window_bounds = array<i64: 128, 128>}, {pipeline_mode = #tpu.pipeline_mode<synchronous>, transform_indices = @transform_4, window_bounds = array<i64: 1, 128>}, {pipeline_mode = #tpu.pipeline_mode<synchronous>, transform_indices = @transform_5, window_bounds = array<i64: 128, 128>}, {pipeline_mode = #tpu.pipeline_mode<synchronous>, transform_indices = @transform_6, window_bounds = array<i64: 1, 128>}, {transform_indices = @transform_7, window_bounds = array<i64: 256, 128>}]} {
    %c0 = arith.constant 0 : index
    %c0_0 = arith.constant 0 : index
    %0 = vector.load %arg1[%c0, %c0_0] : memref<256x784xbf16, #tpu.memory_space<vmem>>, vector<256x784xbf16>
    %c0_1 = arith.constant 0 : index
    %c0_2 = arith.constant 0 : index
    %1 = vector.load %arg2[%c0_1, %c0_2] : memref<784x128xbf16, #tpu.memory_space<vmem>>, vector<784x128xbf16>
    %cst = arith.constant dense<0.000000e+00> : vector<256x128xf32>
    %2 = tpu.matmul %0, %1, %cst {dimension_numbers = #tpu.dot_dimension_numbers<[1], [0], [0], [1], [0, 0, 1, 1], [], []>} : vector<256x784xbf16>, vector<784x128xbf16>, vector<256x128xf32> -> vector<256x128xf32>
    %c0_3 = arith.constant 0 : index
    %c0_4 = arith.constant 0 : index
    %3 = vector.load %arg3[%c0_3, %c0_4] : memref<1x128xf32, #tpu.memory_space<vmem>>, vector<1x128xf32>
    %4 = vector.broadcast %3 : vector<1x128xf32> to vector<256x128xf32>
    %5 = arith.addf %2, %4 : vector<256x128xf32>
    %cst_5 = arith.constant 0.000000e+00 : f32
    %6 = vector.broadcast %cst_5 : f32 to vector<256x128xf32>
    %7 = arith.maximumf %5, %6 : vector<256x128xf32>
    %8 = arith.truncf %7 : vector<256x128xf32> to vector<256x128xbf16>
    %c0_6 = arith.constant 0 : index
    %c0_7 = arith.constant 0 : index
    %9 = vector.load %arg4[%c0_6, %c0_7] : memref<128x128xbf16, #tpu.memory_space<vmem>>, vector<128x128xbf16>
    %cst_8 = arith.constant dense<0.000000e+00> : vector<256x128xf32>
    %10 = tpu.matmul %8, %9, %cst_8 {dimension_numbers = #tpu.dot_dimension_numbers<[1], [0], [0], [1], [0, 0, 1, 1], [], []>} : vector<256x128xbf16>, vector<128x128xbf16>, vector<256x128xf32> -> vector<256x128xf32>
    %c0_9 = arith.constant 0 : index
    %c0_10 = arith.constant 0 : index
    %11 = vector.load %arg5[%c0_9, %c0_10] : memref<1x128xf32, #tpu.memory_space<vmem>>, vector<1x128xf32>
    %12 = vector.broadcast %11 : vector<1x128xf32> to vector<256x128xf32>
    %13 = arith.addf %10, %12 : vector<256x128xf32>
    %cst_11 = arith.constant 0.000000e+00 : f32
    %14 = vector.broadcast %cst_11 : f32 to vector<256x128xf32>
    %15 = arith.maximumf %13, %14 : vector<256x128xf32>
    %16 = arith.truncf %15 : vector<256x128xf32> to vector<256x128xbf16>
    %c0_12 = arith.constant 0 : index
    %c0_13 = arith.constant 0 : index
    %17 = vector.load %arg6[%c0_12, %c0_13] : memref<128x128xbf16, #tpu.memory_space<vmem>>, vector<128x128xbf16>
    %cst_14 = arith.constant dense<0.000000e+00> : vector<256x128xf32>
    %18 = tpu.matmul %16, %17, %cst_14 {dimension_numbers = #tpu.dot_dimension_numbers<[1], [0], [0], [1], [0, 0, 1, 1], [], []>} : vector<256x128xbf16>, vector<128x128xbf16>, vector<256x128xf32> -> vector<256x128xf32>
    %c0_15 = arith.constant 0 : index
    %c0_16 = arith.constant 0 : index
    %19 = vector.load %arg7[%c0_15, %c0_16] : memref<1x128xf32, #tpu.memory_space<vmem>>, vector<1x128xf32>
    %20 = vector.broadcast %19 : vector<1x128xf32> to vector<256x128xf32>
    %21 = arith.addf %18, %20 : vector<256x128xf32>
    %22 = tpu.iota {dimensions = array<i32: 1>} : vector<256x128xi32>
    %c10_i32 = arith.constant 10 : i32
    %23 = vector.broadcast %c10_i32 : i32 to vector<256x128xi32>
    %24 = arith.cmpi slt, %22, %23 : vector<256x128xi32>
    %cst_17 = arith.constant -1.000000e+30 : f32
    %25 = vector.broadcast %cst_17 : f32 to vector<256x128xf32>
    %26 = arith.select %24, %21, %25 : vector<256x128xi1>, vector<256x128xf32>
    %cst_18 = arith.constant dense<0xFF800000> : vector<256xf32>
    %27 = vector.multi_reduction <maximumf>, %26, %cst_18 [1] : vector<256x128xf32> to vector<256xf32>
    %28 = vector.shape_cast %27 : vector<256xf32> to vector<256x1xf32>
    %29 = vector.broadcast %28 : vector<256x1xf32> to vector<256x128xf32>
    %30 = arith.subf %26, %29 : vector<256x128xf32>
    %31 = math.exp %30 : vector<256x128xf32>
    %cst_19 = arith.constant dense<0.000000e+00> : vector<256xf32>
    %32 = vector.multi_reduction <add>, %31, %cst_19 [1] : vector<256x128xf32> to vector<256xf32>
    %33 = vector.shape_cast %32 : vector<256xf32> to vector<256x1xf32>
    %34 = math.log %33 : vector<256x1xf32>
    %35 = vector.broadcast %34 : vector<256x1xf32> to vector<256x128xf32>
    %36 = arith.subf %30, %35 : vector<256x128xf32>
    %c0_20 = arith.constant 0 : index
    %c0_21 = arith.constant 0 : index
    %37 = vector.load %arg8[%c0_20, %c0_21] : memref<256x128xf32, #tpu.memory_space<vmem>>, vector<256x128xf32>
    tpu.vector_store %arg8[%c0_20, %c0_21], %36 {strides = array<i32>} : memref<256x128xf32, #tpu.memory_space<vmem>>, vector<256x128xf32>,
    return
  }
  func.func @transform_0(%arg0: i32) -> (i32, i32) {
    %c0_i32 = arith.constant 0 : i32
    %c0_i32_0 = arith.constant 0 : i32
    return %arg0, %c0_i32 : i32, i32
  }
  func.func @transform_1(%arg0: i32) -> (i32, i32) {
    %c0_i32 = arith.constant 0 : i32
    %c0_i32_0 = arith.constant 0 : i32
    %c0_i32_1 = arith.constant 0 : i32
    return %c0_i32, %c0_i32_0 : i32, i32
  }
  func.func @transform_2(%arg0: i32) -> (i32, i32) {
    %c0_i32 = arith.constant 0 : i32
    %c0_i32_0 = arith.constant 0 : i32
    %c0_i32_1 = arith.constant 0 : i32
    return %c0_i32, %c0_i32_0 : i32, i32
  }
  func.func @transform_3(%arg0: i32) -> (i32, i32) {
    %c0_i32 = arith.constant 0 : i32
    %c0_i32_0 = arith.constant 0 : i32
    %c0_i32_1 = arith.constant 0 : i32
    return %c0_i32, %c0_i32_0 : i32, i32
  }
  func.func @transform_4(%arg0: i32) -> (i32, i32) {
    %c0_i32 = arith.constant 0 : i32
    %c0_i32_0 = arith.constant 0 : i32
    %c0_i32_1 = arith.constant 0 : i32
    return %c0_i32, %c0_i32_0 : i32, i32
  }
  func.func @transform_5(%arg0: i32) -> (i32, i32) {
    %c0_i32 = arith.constant 0 : i32
    %c0_i32_0 = arith.constant 0 : i32
    %c0_i32_1 = arith.constant 0 : i32
    return %c0_i32, %c0_i32_0 : i32, i32
  }
  func.func @transform_6(%arg0: i32) -> (i32, i32) {
    %c0_i32 = arith.constant 0 : i32
    %c0_i32_0 = arith.constant 0 : i32
    %c0_i32_1 = arith.constant 0 : i32
    return %c0_i32, %c0_i32_0 : i32, i32
  }
  func.func @transform_7(%arg0: i32) -> (i32, i32) {
    %c0_i32 = arith.constant 0 : i32
    %c0_i32_0 = arith.constant 0 : i32
    return %arg0, %c0_i32 : i32, i32
  }
}

</mosaic_0001>

<bundles_post_ra>
// kernel: tpu_custom_call.1
= control target key start
LH: loop header
LB: loop body
LE: loop exit
PB: predicated region body
PF: predicated region fallthrough
CT: control target
= control target key end

     0   :  { %s5167_s0 = inlined_call_operand.vmem [shape: bf16[256,784], index: 0, kind: input, shape index: {}]   ;;  %s5168_s1 = inlined_call_operand.vmem [shape: bf16[784,128], index: 1, kind: input, shape index: {}]   ;;  %s5169_s2 = inlined_call_operand.vmem [shape: f32[1,128], index: 2, kind: input, shape index: {}]   ;;  %s5170_s3 = inlined_call_operand.vmem [shape: bf16[128,128], index: 3, kind: input, shape index: {}]   ;;  %s5171_s4 = inlined_call_operand.vmem [shape: f32[1,128], index: 4, kind: input, shape index: {}]   ;;  %s5172_s5 = inlined_call_operand.vmem [shape: bf16[128,128], index: 5, kind: input, shape index: {}]   ;;  %s5173_s6 = inlined_call_operand.vmem [shape: f32[1,128], index: 6, kind: input, shape index: {}]   ;;  %s5174_s7 = inlined_call_operand.hbm [shape: f32[256,128], index: 7, kind: output, shape index: {}]  }
   0x1   :  { %v3517_v0 = vld [vmem:[%s5168_s1 + $0x40] sm:$0xff]   ;;  %v3519_v2 = vld [vmem:[%s5168_s1 + $0x48] sm:$0xff]   ;;  %v3521_v4 = vld [vmem:[%s5168_s1 + $0x50] sm:$0xff]  }
   0x2   :  { %v3518_v1 = vld [vmem:[%s5168_s1] sm:$0xff]   ;;  %2967 = vmatprep.subr.bf16.mxu0 %v3517_v0  ;;  %3498 = vmatprep.subr.bf16.mxu1 %v3517_v0  ;;  %v3520_v3 = vld [vmem:[%s5168_s1 + $0x8] sm:$0xff]   ;;  %v3522_v5 = vld [vmem:[%s5168_s1 + $0x10] sm:$0xff]  }
   0x3   :  { %2968 = vmatpush3.bf16.msra.mxu0 %v3518_v1  ;;  %3506 = vmatpush3.bf16.msra.mxu1 %v3518_v1  ;;  %v3523_v6 = vld [vmem:[%s5168_s1 + $0x58] sm:$0xff]   ;;  %v3525_v8 = vld [vmem:[%s5168_s1 + $0x60] sm:$0xff]   ;;  %v3527_v10 = vld [vmem:[%s5168_s1 + $0x68] sm:$0xff]  }
   0x4   :  { %2969 = vmatprep.subr.bf16.mxu0 %v3519_v2  ;;  %3499 = vmatprep.subr.bf16.mxu1 %v3519_v2  ;;  %v3524_v7 = vld [vmem:[%s5168_s1 + $0x18] sm:$0xff]   ;;  %v3526_v9 = vld [vmem:[%s5168_s1 + $0x20] sm:$0xff]   ;;  %v3528_v13 = vld [vmem:[%s5168_s1 + $0x28] sm:$0xff]  }
   0x5   :  { %v3535_v11 = vld [vmem:[%s5167_s0 + $0x4] ss:$28 sps:$4 sm:$0xff]   ;;  %v3529_v14 = vld [vmem:[%s5168_s1 + $0x70] sm:$0xff]   ;;  %v3531_v16 = vld [vmem:[%s5168_s1 + $0x78] sm:$0xff]  }
   0x6   :  { %v3538_v12 = vld [vmem:[%s5167_s0 + $0x2a4] ss:$28 sps:$4 sm:$0xff]   ;;  %1196 = vmatprep.mubr.bf16.mxu0 %v3535_v11  ;;  %v3530_v15 = vld [vmem:[%s5168_s1 + $0x30] sm:$0xff]   ;;  %v3532_v17 = vld [vmem:[%s5168_s1 + $0x38] sm:$0xff]  }
   0x7   :  { %2970 = vmatpush3.bf16.msra.mxu0 %v3520_v3  ;;  %3507 = vmatpush3.bf16.msra.mxu1 %v3520_v3  ;;  %v3539_v18 = vld [vmem:[%s5168_s1 + $0xc0] sm:$0xff]   ;;  %v3543_v24 = vld [vmem:[%s5168_s1 + $0xc8] sm:$0xff]   ;;  %v3545_v25 = vld [vmem:[%s5167_s0 + $0x3c] ss:$28 sps:$4 sm:$0xff]  }
   0x8   :  { %2971 = vmatprep.subr.bf16.mxu0 %v3521_v4  ;;  %3500 = vmatprep.subr.bf16.mxu1 %v3521_v4  ;;  %v3533_v19 = vld [vmem:[%s5167_s0] ss:$28 sps:$4 sm:$0xff]   ;;  %v3554_v27 = vld [vmem:[%s5168_s1 + $0x148] sm:$0xff]   ;;  %v3549_v30 = vld [vmem:[%s5167_s0 + $0x38] ss:$28 sps:$4 sm:$0xff]  }
   0x9   :  { %1292 = vmatprep.mubr.bf16.mxu1 %v3538_v12  ;;  %v3536_v20 = vld [vmem:[%s5167_s0 + $0x2a0] ss:$28 sps:$4 sm:$0xff]   ;;  %v3544_v28 = vld [vmem:[%s5168_s1 + $0x88] sm:$0xff]   ;;  %v3550_v31 = vld [vmem:[%s5167_s0 + $0x2d8] ss:$28 sps:$4 sm:$0xff]  }
   0xa   :  { %v3540_v21 = vld [vmem:[%s5168_s1 + $0x140] sm:$0xff]   ;;  %v3547_v26 = vld [vmem:[%s5167_s0 + $0x2dc] ss:$28 sps:$4 sm:$0xff]   ;;  %v3556_v29 = vld [vmem:[%s5168_s1 + $0x108] sm:$0xff]  }
   0xb   :  { %2972 = vmatpush3.bf16.msra.mxu0 %v3522_v5  ;;  %3508 = vmatpush3.bf16.msra.mxu1 %v3522_v5  ;;  %v3541_v22 = vld [vmem:[%s5168_s1 + $0x80] sm:$0xff]   ;;  %v3551_v32 = vld [vmem:[%s5168_s1 + $0xd0] sm:$0xff]   ;;  %v3553_v34 = vld [vmem:[%s5168_s1 + $0xd8] sm:$0xff]  }
   0xc   :  { %2973 = vmatprep.subr.bf16.mxu0 %v3523_v6  ;;  %3501 = vmatprep.subr.bf16.mxu1 %v3523_v6  ;;  %v3542_v23 = vld [vmem:[%s5168_s1 + $0x100] sm:$0xff]   ;;  %v3552_v33 = vld [vmem:[%s5168_s1 + $0x90] sm:$0xff]   ;;  %v3555_v37 = vld [vmem:[%s5168_s1 + $0x98] sm:$0xff]  }
   0xd   :  { %v3557_v35 = vld [vmem:[%s5167_s0 + $0x74] ss:$28 sps:$4 sm:$0xff]   ;;  %v3563_v38 = vld [vmem:[%s5168_s1 + $0xe0] sm:$0xff]   ;;  %v3565_v43 = vld [vmem:[%s5168_s1 + $0xe8] sm:$0xff]  }
   0xe   :  { %v3559_v36 = vld [vmem:[%s5167_s0 + $0x314] ss:$28 sps:$4 sm:$0xff]   ;;  %v3564_v42 = vld [vmem:[%s5168_s1 + $0xa0] sm:$0xff]   ;;  %v3567_v45 = vld [vmem:[%s5167_s0 + $0xac] ss:$28 sps:$4 sm:$0xff]  }
   0xf   :  { %2974 = vmatpush3.bf16.msra.mxu0 %v3524_v7  ;;  %3509 = vmatpush3.bf16.msra.mxu1 %v3524_v7  ;;  %v3561_v39 = vld [vmem:[%s5167_s0 + $0x70] ss:$28 sps:$4 sm:$0xff]   ;;  %v3571_v48 = vld [vmem:[%s5167_s0 + $0xa8] ss:$28 sps:$4 sm:$0xff]   ;;  %v3586_v52 = vld [vmem:[%s5168_s1 + $0x158] sm:$0xff]  }
  0x10   :  { %2975 = vmatprep.subr.bf16.mxu0 %v3525_v8  ;;  %3502 = vmatprep.subr.bf16.mxu1 %v3525_v8  ;;  %v3562_v40 = vld [vmem:[%s5167_s0 + $0x310] ss:$28 sps:$4 sm:$0xff]   ;;  %v3572_v49 = vld [vmem:[%s5167_s0 + $0x348] ss:$28 sps:$4 sm:$0xff]   ;;  %v3587_v53 = vld [vmem:[%s5168_s1 + $0x118] sm:$0xff]  }
  0x11   :  { %v3574_v41 = vld [vmem:[%s5168_s1 + $0x150] sm:$0xff]   ;;  %v3569_v46 = vld [vmem:[%s5167_s0 + $0x34c] ss:$28 sps:$4 sm:$0xff]   ;;  %v3579_v54 = vld [vmem:[%s5167_s0 + $0xe4] ss:$28 sps:$4 sm:$0xff]  }
  0x12   :  { %v3576_v44 = vld [vmem:[%s5168_s1 + $0x110] sm:$0xff]   ;;  %v3566_v47 = vld [vmem:[%s5168_s1 + $0xa8] sm:$0xff]   ;;  %v3577_v55 = vld [vmem:[%s5168_s1 + $0xf8] sm:$0xff]  }
  0x13   :  { %2976 = vmatpush3.bf16.msra.mxu0 %v3526_v9  ;;  %3510 = vmatpush3.bf16.msra.mxu1 %v3526_v9  ;;  %v3573_v50 = vld [vmem:[%s5168_s1 + $0xf0] sm:$0xff]   ;;  %v3583_v56 = vld [vmem:[%s5167_s0 + $0xc] ss:$28 sps:$4 sm:$0xff]   ;;  %v3578_v57 = vld [vmem:[%s5168_s1 + $0xb8] sm:$0xff]  }
  0x14   :  { %2977 = vmatprep.subr.bf16.mxu0 %v3527_v10  ;;  %3503 = vmatprep.subr.bf16.mxu1 %v3527_v10  ;;  %v3575_v51 = vld [vmem:[%s5168_s1 + $0xb0] sm:$0xff]   ;;  %v3585_v58 = vld [vmem:[%s5168_s1 + $0x180] sm:$0xff]   ;;  %v3588_v63 = vld [vmem:[%s5167_s0 + $0x11c] ss:$28 sps:$4 sm:$0xff]  }
  0x15   :  { %v3581_v59 = vld [vmem:[%s5167_s0 + $0x8] ss:$28 sps:$4 sm:$0xff]   ;;  %v3584_v62 = vld [vmem:[%s5167_s0 + $0xe0] ss:$28 sps:$4 sm:$0xff]   ;;  %v3592_v3 = vld [vmem:[%s5167_s0 + $0x118] ss:$28 sps:$4 sm:$0xff]  }
  0x16   :  { %v3600_v60 = vld [vmem:[%s5168_s1 + $0x160] sm:$0xff]   ;;  %v3608_v1 = vld [vmem:[%s5168_s1 + $0x168] sm:$0xff]   ;;  %v3594_v5 = vld [vmem:[%s5167_s0 + $0x154] ss:$28 sps:$4 sm:$0xff]  }
  0x17   :  { %2978 = vmatpush3.bf16.msra.mxu0 %v3528_v13  ;;  %3511 = vmatpush3.bf16.msra.mxu1 %v3528_v13  ;;  %v3601_v61 = vld [vmem:[%s5168_s1 + $0x120] sm:$0xff]   ;;  %v3609_v2 = vld [vmem:[%s5168_s1 + $0x128] sm:$0xff]   ;;  %v3596_v6 = vld [vmem:[%s5167_s0 + $0x7c] ss:$28 sps:$4 sm:$0xff]  }
  0x18   :  { %2979 = vmatprep.subr.bf16.mxu0 %v3529_v14  ;;  %3504 = vmatprep.subr.bf16.mxu1 %v3529_v14  ;;  %v3590_v0 = vld [vmem:[%s5167_s0 + $0x44] ss:$28 sps:$4 sm:$0xff]   ;;  %v3622_v7 = vld [vmem:[%s5168_s1 + $0x170] sm:$0xff]   ;;  %v3602_v11 = vld [vmem:[%s5167_s0 + $0x18c] ss:$28 sps:$4 sm:$0xff]  }
  0x19   :  { %v3593_v4 = vld [vmem:[%s5167_s0 + $0x40] ss:$28 sps:$4 sm:$0xff]   ;;  %v3623_v8 = vld [vmem:[%s5168_s1 + $0x130] sm:$0xff]  }
  0x1a   :  { %v3598_v9 = vld [vmem:[%s5167_s0 + $0x150] ss:$28 sps:$4 sm:$0xff]   ;;  %v3599_v10 = vld [vmem:[%s5167_s0 + $0x78] ss:$28 sps:$4 sm:$0xff]  }
  0x1b   :  { %2980 = vmatpush3.bf16.msra.mxu0 %v3530_v15  ;;  %3512 = vmatpush3.bf16.msra.mxu1 %v3530_v15  ;;  %v3630_v12 = vld [vmem:[%s5168_s1 + $0x178] sm:$0xff]   ;;  %v3604_v14 = vld [vmem:[%s5167_s0 + $0xb4] ss:$28 sps:$4 sm:$0xff]   ;;  %v3606_v15 = vld [vmem:[%s5167_s0 + $0x188] ss:$28 sps:$4 sm:$0xff]  }
  0x1c   :  { %2981 = vmatprep.subr.bf16.mxu0 %v3531_v16  ;;  %3505 = vmatprep.subr.bf16.mxu1 %v3531_v16  ;;  %v3631_v13 = vld [vmem:[%s5168_s1 + $0x138] sm:$0xff]   ;;  %v3607_v16 = vld [vmem:[%s5167_s0 + $0xb0] ss:$28 sps:$4 sm:$0xff]  }
  0x1f   :  { %2982 = vmatpush3.bf16.msra.mxu0 %v3532_v17  ;;  %3513 = vmatpush3.bf16.msra.mxu1 %v3532_v17  ;;  %v3610_v17 = vld [vmem:[%s5167_s0 + $0x1c4] ss:$28 sps:$4 sm:$0xff]  }
  0x20   :  { %3079 = vmatprep.subr.bf16.mxu1 %v3539_v18  ;;  %3191 = vmatprep.subr.bf16.mxu0 %v3540_v21  ;;  %v3612_v18 = vld [vmem:[%s5167_s0 + $0xec] ss:$28 sps:$4 sm:$0xff]   ;;  %v3616_v21 = vld [vmem:[%s5167_s0 + $0x1fc] ss:$28 sps:$4 sm:$0xff]  }
  0x22   :  { %1197 = vmatmul.mubr.bf16.vlgmr.msra.gmra.mrb[0].mxu0 %v3533_v19  ;;  %1293 = vmatmul.mubr.bf16.vlgmr.msra.gmra.mrb[0].mxu1 %v3536_v20  ;;  %v3614_v19 = vld [vmem:[%s5167_s0 + $0x1c0] ss:$28 sps:$4 sm:$0xff]   ;;  %v3615_v20 = vld [vmem:[%s5167_s0 + $0xe8] ss:$28 sps:$4 sm:$0xff]  }
  0x23   :  { %3080 = vmatpush3.bf16.msra.mxu1 %v3541_v22  ;;  %3192 = vmatpush3.bf16.msra.mxu0 %v3542_v23  ;;  %v3618_v22 = vld [vmem:[%s5167_s0 + $0x124] ss:$28 sps:$4 sm:$0xff]   ;;  %v3620_v23 = vld [vmem:[%s5167_s0 + $0x1f8] ss:$28 sps:$4 sm:$0xff]  }
  0x24   :  { %3081 = vmatprep.subr.bf16.mxu1 %v3543_v24  ;;  %1204 = vmatprep.mubr.bf16.mxu0 %v3545_v25  ;;  %v3621_v24 = vld [vmem:[%s5167_s0 + $0x120] ss:$28 sps:$4 sm:$0xff]   ;;  %v3624_v25 = vld [vmem:[%s5167_s0 + $0x234] ss:$28 sps:$4 sm:$0xff]  }
  0x25   :  { %1300 = vmatprep.mubr.bf16.mxu1 %v3547_v26  ;;  %3193 = vmatprep.subr.bf16.mxu0 %v3554_v27  ;;  %v3626_v26 = vld [vmem:[%s5167_s0 + $0x15c] ss:$28 sps:$4 sm:$0xff]   ;;  %v3628_v27 = vld [vmem:[%s5167_s0 + $0x230] ss:$28 sps:$4 sm:$0xff]  }
  0x27   :  { %3082 = vmatpush3.bf16.msra.mxu1 %v3544_v28  ;;  %3194 = vmatpush3.bf16.msra.mxu0 %v3556_v29  ;;  %v3629_v28 = vld [vmem:[%s5167_s0 + $0x158] ss:$28 sps:$4 sm:$0xff]   ;;  %v3632_v29 = vld [vmem:[%s5167_s0 + $0x26c] ss:$28 sps:$4 sm:$0xff]  }
  0x28   :  { %3083 = vmatprep.subr.bf16.mxu1 %v3551_v32  ;;  %3195 = vmatprep.subr.bf16.mxu0 %v3574_v41  ;;  %v3637_v32 = vld [vmem:[%s5167_s0 + $0x190] ss:$28 sps:$4 sm:$0xff]   ;;  %v3650_v41 = vld [vmem:[%s5167_s0 + $0x23c] ss:$28 sps:$4 sm:$0xff]  }
  0x2a   :  { %1205 = vmatmul.mubr.bf16.gmra.mrb[4].mxu0 %v3549_v30  ;;  %1301 = vmatmul.mubr.bf16.gmra.mrb[4].mxu1 %v3550_v31  ;;  %v3634_v30 = vld [vmem:[%s5167_s0 + $0x194] ss:$28 sps:$4 sm:$0xff]   ;;  %v3636_v31 = vld [vmem:[%s5167_s0 + $0x268] ss:$28 sps:$4 sm:$0xff]  }
  0x2b   :  { %3084 = vmatpush3.bf16.msra.mxu1 %v3552_v33  ;;  %1212 = vmatprep.mubr.bf16.mxu0 %v3557_v35  ;;  %v3638_v33 = vld [vmem:[%s5167_s0 + $0x1cc] ss:$28 sps:$4 sm:$0xff]  }
  0x2c   :  { %3085 = vmatprep.subr.bf16.mxu1 %v3553_v34  ;;  %1308 = vmatprep.mubr.bf16.mxu1 %v3559_v36  ;;  %v3642_v34 = vld [vmem:[%s5167_s0 + $0x14] ss:$28 sps:$4 sm:$0xff]   ;;  %v3643_v36 = vld [vmem:[%s5167_s0 + $0x1c8] ss:$28 sps:$4 sm:$0xff]  }
  0x2d   :  { %3196 = vmatpush3.bf16.msra.mxu0 %v3576_v44  ;;  %v3640_v35 = vld [vmem:[%s5167_s0 + $0x10] ss:$28 sps:$4 sm:$0xff]  }
  0x2e   :  { %3197 = vmatprep.subr.bf16.mxu0 %v3586_v52 }
  0x2f   :  { %3086 = vmatpush3.bf16.msra.mxu1 %v3555_v37  ;;  %v3644_v37 = vld [vmem:[%s5167_s0 + $0x204] ss:$28 sps:$4 sm:$0xff]  }
  0x30   :  { %3087 = vmatprep.subr.bf16.mxu1 %v3563_v38  ;;  %v3646_v38 = vld [vmem:[%s5167_s0 + $0x4c] ss:$28 sps:$4 sm:$0xff]  }
  0x31   :  { %3198 = vmatpush3.bf16.msra.mxu0 %v3587_v53 }
  0x32   :  { %1213 = vmatmul.mubr.bf16.gmra.mrb[8].mxu0 %v3561_v39  ;;  %1309 = vmatmul.mubr.bf16.gmra.mrb[8].mxu1 %v3562_v40  ;;  %v3648_v39 = vld [vmem:[%s5167_s0 + $0x200] ss:$28 sps:$4 sm:$0xff]   ;;  %v3649_v40 = vld [vmem:[%s5167_s0 + $0x48] ss:$28 sps:$4 sm:$0xff]  }
  0x33   :  { %3088 = vmatpush3.bf16.msra.mxu1 %v3564_v42  ;;  %1220 = vmatprep.mubr.bf16.mxu0 %v3567_v45  ;;  %v3652_v42 = vld [vmem:[%s5167_s0 + $0x84] ss:$28 sps:$4 sm:$0xff]  }
  0x34   :  { %3089 = vmatprep.subr.bf16.mxu1 %v3565_v43  ;;  %1316 = vmatprep.mubr.bf16.mxu1 %v3569_v46 }
  0x35   :  { %3199 = vmatprep.subr.bf16.mxu0 %v3600_v60 }
  0x36   :  { %3200 = vmatpush3.bf16.msra.mxu0 %v3601_v61 }
  0x37   :  { %3090 = vmatpush3.bf16.msra.mxu1 %v3566_v47  ;;  %3201 = vmatprep.subr.bf16.mxu0 %v3608_v1 }
  0x38   :  { %3091 = vmatprep.subr.bf16.mxu1 %v3573_v50 }
  0x3a   :  { %1221 = vmatmul.mubr.bf16.gmra.mrb[12].mxu0 %v3571_v48  ;;  %1317 = vmatmul.mubr.bf16.gmra.mrb[12].mxu1 %v3572_v49 }
  0x3b   :  { %3092 = vmatpush3.bf16.msra.mxu1 %v3575_v51  ;;  %1228 = vmatprep.mubr.bf16.mxu0 %v3579_v54 }
  0x3c   :  { %3093 = vmatprep.subr.bf16.mxu1 %v3577_v55  ;;  %1357 = vmatprep.mubr.bf16.mxu1 %v3583_v56 }
  0x3d   :  { %3202 = vmatpush3.bf16.msra.mxu0 %v3609_v2 }
  0x3e   :  { %3203 = vmatprep.subr.bf16.mxu0 %v3622_v7 }
  0x3f   :  { %3094 = vmatpush3.bf16.msra.mxu1 %v3578_v57 }
  0x40   :  { %3368 = vmatprep.subr.bf16.mxu1 %v3585_v58 }
  0x41   :  { %3204 = vmatpush3.bf16.msra.mxu0 %v3623_v8 }
  0x42   :  { %1229 = vmatmul.mubr.bf16.gmra.mrb[16].mxu0 %v3584_v62  ;;  %1358 = vmatmul.mubr.bf16.vlgmr.msra.gmra.mrb[16].mxu1 %v3581_v59 }
  0x43   :  { %3369 = vmatpush3.bf16.msra.mxu1 %v3585_v58  ;;  %1236 = vmatprep.mubr.bf16.mxu0 %v3588_v63 }
  0x44   :  { %1365 = vmatprep.mubr.bf16.mxu1 %v3590_v0  ;;  %3205 = vmatprep.subr.bf16.mxu0 %v3630_v12 }
  0x45   :  { %3206 = vmatpush3.bf16.msra.mxu0 %v3631_v13 }
  0x4a   :  { %1237 = vmatmul.mubr.bf16.gmra.mrb[20].mxu0 %v3592_v3  ;;  %1366 = vmatmul.mubr.bf16.gmra.mrb[20].mxu1 %v3593_v4 }
  0x4b   :  { %1244 = vmatprep.mubr.bf16.mxu0 %v3594_v5  ;;  %1373 = vmatprep.mubr.bf16.mxu1 %v3596_v6 }
  0x52   :  { %1245 = vmatmul.mubr.bf16.gmra.mrb[24].mxu0 %v3598_v9  ;;  %1374 = vmatmul.mubr.bf16.gmra.mrb[24].mxu1 %v3599_v10 }
  0x53   :  { %1252 = vmatprep.mubr.bf16.mxu0 %v3602_v11  ;;  %1381 = vmatprep.mubr.bf16.mxu1 %v3604_v14 }
  0x5a   :  { %1253 = vmatmul.mubr.bf16.gmra.mrb[28].mxu0 %v3606_v15  ;;  %1382 = vmatmul.mubr.bf16.gmra.mrb[28].mxu1 %v3607_v16 }
  0x5b   :  { %1260 = vmatprep.mubr.bf16.mxu0 %v3610_v17  ;;  %1389 = vmatprep.mubr.bf16.mxu1 %v3612_v18 }
  0x62   :  { %1261 = vmatmul.mubr.bf16.gmra.mrb[32].mxu0 %v3614_v19  ;;  %1390 = vmatmul.mubr.bf16.gmra.mrb[32].mxu1 %v3615_v20 }
  0x63   :  { %1268 = vmatprep.mubr.bf16.mxu0 %v3616_v21  ;;  %1397 = vmatprep.mubr.bf16.mxu1 %v3618_v22 }
  0x6a   :  { %1269 = vmatmul.mubr.bf16.gmra.mrb[36].mxu0 %v3620_v23  ;;  %1398 = vmatmul.mubr.bf16.gmra.mrb[36].mxu1 %v3621_v24 }
  0x6b   :  { %1276 = vmatprep.mubr.bf16.mxu0 %v3624_v25  ;;  %1405 = vmatprep.mubr.bf16.mxu1 %v3626_v26 }
  0x72   :  { %1277 = vmatmul.mubr.bf16.gmra.mrb[40].mxu0 %v3628_v27  ;;  %1406 = vmatmul.mubr.bf16.gmra.mrb[40].mxu1 %v3629_v28 }
  0x73   :  { %1284 = vmatprep.mubr.bf16.mxu0 %v3632_v29  ;;  %1413 = vmatprep.mubr.bf16.mxu1 %v3634_v30 }
  0x7a   :  { %1285 = vmatmul.mubr.bf16.gmra.mrb[44].mxu0 %v3636_v31  ;;  %1414 = vmatmul.mubr.bf16.gmra.mrb[44].mxu1 %v3637_v32 }
  0x7b   :  { %1421 = vmatprep.mubr.bf16.mxu1 %v3638_v33  ;;  %1518 = vmatprep.mubr.bf16.mxu0 %v3642_v34 }
  0x82   :  { %1422 = vmatmul.mubr.bf16.gmra.mrb[48].mxu1 %v3643_v36  ;;  %1519 = vmatmul.mubr.bf16.vlgmr.msra.gmra.mrb[48].mxu0 %v3640_v35 }
  0x83   :  { %1429 = vmatprep.mubr.bf16.mxu1 %v3644_v37  ;;  %1526 = vmatprep.mubr.bf16.mxu0 %v3646_v38 }
  0x8a   :  { %1430 = vmatmul.mubr.bf16.gmra.mrb[52].mxu1 %v3648_v39  ;;  %1527 = vmatmul.mubr.bf16.gmra.mrb[52].mxu0 %v3649_v40 }
  0x8b   :  { %1437 = vmatprep.mubr.bf16.mxu1 %v3650_v41  ;;  %1534 = vmatprep.mubr.bf16.mxu0 %v3652_v42 }
  0x8c   :  { %12 = vsyncpa [#allocation3], 0  ;;  %v3654_v43 = vld [vmem:[%s5167_s0 + $0x238] ss:$28 sps:$4 sm:$0xff]   ;;  %v3655_v44 = vld [vmem:[%s5167_s0 + $0x80] ss:$28 sps:$4 sm:$0xff]  }
  0x8d   :  { %v3656_v45 = vld [vmem:[%s5167_s0 + $0x274] ss:$28 sps:$4 sm:$0xff]   ;;  %v3658_v46 = vld [vmem:[%s5167_s0 + $0xbc] ss:$28 sps:$4 sm:$0xff]   ;;  %v3662_v49 = vld [vmem:[%s5167_s0 + $0x2ac] ss:$28 sps:$4 sm:$0xff]  }
  0x8e   :  { %v3660_v47 = vld [vmem:[%s5167_s0 + $0x270] ss:$28 sps:$4 sm:$0xff]   ;;  %v3661_v48 = vld [vmem:[%s5167_s0 + $0xb8] ss:$28 sps:$4 sm:$0xff]   ;;  %v3666_v51 = vld [vmem:[%s5167_s0 + $0x2a8] ss:$28 sps:$4 sm:$0xff]  }
  0x8f   :  { %v3664_v50 = vld [vmem:[%s5167_s0 + $0xf4] ss:$28 sps:$4 sm:$0xff]   ;;  %v3668_v53 = vld [vmem:[%s5167_s0 + $0x2e4] ss:$28 sps:$4 sm:$0xff]   ;;  %v3670_v54 = vld [vmem:[%s5167_s0 + $0x12c] ss:$28 sps:$4 sm:$0xff]  }
  0x90   :  { %v3667_v52 = vld [vmem:[%s5167_s0 + $0xf0] ss:$28 sps:$4 sm:$0xff]   ;;  %v3672_v55 = vld [vmem:[%s5167_s0 + $0x2e0] ss:$28 sps:$4 sm:$0xff]   ;;  %v3673_v56 = vld [vmem:[%s5167_s0 + $0x128] ss:$28 sps:$4 sm:$0xff]  }
  0x91   :  { %v3674_v57 = vld [vmem:[%s5167_s0 + $0x31c] ss:$28 sps:$4 sm:$0xff]   ;;  %v3676_v58 = vld [vmem:[%s5167_s0 + $0x164] ss:$28 sps:$4 sm:$0xff]   ;;  %v3680_v61 = vld [vmem:[%s5167_s0 + $0x354] ss:$28 sps:$4 sm:$0xff]  }
  0x92   :  { %1438 = vmatmul.mubr.bf16.gmra.mrb[56].mxu1 %v3654_v43  ;;  %1535 = vmatmul.mubr.bf16.gmra.mrb[56].mxu0 %v3655_v44  ;;  %v3678_v59 = vld [vmem:[%s5167_s0 + $0x318] ss:$28 sps:$4 sm:$0xff]   ;;  %v3679_v60 = vld [vmem:[%s5167_s0 + $0x160] ss:$28 sps:$4 sm:$0xff]   ;;  %v3684_v63 = vld [vmem:[%s5167_s0 + $0x350] ss:$28 sps:$4 sm:$0xff]  }
  0x93   :  { %1445 = vmatprep.mubr.bf16.mxu1 %v3656_v45  ;;  %1542 = vmatprep.mubr.bf16.mxu0 %v3658_v46  ;;  %v3682_v62 = vld [vmem:[%s5167_s0 + $0x19c] ss:$28 sps:$4 sm:$0xff]   ;;  %v3686_v1 = vld [vmem:[%s5167_s0 + $0x1d4] ss:$28 sps:$4 sm:$0xff]   ;;  %vm1115_vm0 = vcmask 130048   ;;  %v3726_v23 = vld [vmem:[%s5170_s3] sm:$0xff]  }
  0x94   :  { %v3685_v0 = vld [vmem:[%s5167_s0 + $0x198] ss:$28 sps:$4 sm:$0xff]   ;;  %v3689_v3 = vld [vmem:[%s5167_s0 + $0x1d0] ss:$28 sps:$4 sm:$0xff]   ;;  %v3693_v6 = vld [vmem:[%s5167_s0 + $0x88] ss:$28 sps:$4 sm:$0xff]   ;;  %3402 = vmatprep.subr.bf16.mxu1 %v3726_v23 }
  0x95   :  { %v3688_v2 = vld [vmem:[%s5167_s0 + $0x18] ss:$28 sps:$4 sm:$0xff]   ;;  %v3690_v4 = vld [vmem:[%s5167_s0 + $0x50] ss:$28 sps:$4 sm:$0xff]   ;;  %v3694_v7 = vld [vmem:[%s5167_s0 + $0x208] ss:$28 sps:$4 sm:$0xff]  }
  0x96   :  { %v3691_v5 = vld [vmem:[%s5167_s0 + $0x20c] ss:$28 sps:$4 sm:$0xff]   ;;  %v3695_v8 = vld [vmem:[%s5167_s0 + $0xc0] ss:$28 sps:$4 sm:$0xff]   ;;  %v3698_v10 = vld [vmem:[%s5167_s0 + $0xf8] ss:$28 sps:$4 sm:$0xff]  }
  0x97   :  { %v3696_v9 = vld [vmem:[%s5167_s0 + $0x244] ss:$28 sps:$4 sm:$0xff]   ;;  %v3700_v12 = vld [vmem:[%s5167_s0 + $0x130] ss:$28 sps:$4 sm:$0xff]   ;;  %v3701_v13 = vld [vmem:[%s5167_s0 + $0x27c] ss:$28 sps:$4 sm:$0xff]  }
  0x98   :  { %v3699_v11 = vld [vmem:[%s5167_s0 + $0x240] ss:$28 sps:$4 sm:$0xff]   ;;  %v3703_v14 = vld [vmem:[%s5167_s0 + $0x168] ss:$28 sps:$4 sm:$0xff]   ;;  %v3704_v15 = vld [vmem:[%s5167_s0 + $0x278] ss:$28 sps:$4 sm:$0xff]  }
  0x99   :  { %v3705_v16 = vld [vmem:[%s5167_s0 + $0x1a0] ss:$28 sps:$4 sm:$0xff]   ;;  %v3706_v17 = vld [vmem:[%s5167_s0 + $0x2b4] ss:$28 sps:$4 sm:$0xff]   ;;  %v3711_v21 = vld [vmem:[%s5167_s0 + $0x2ec] ss:$28 sps:$4 sm:$0xff]  }
  0x9a   :  { %1446 = vmatmul.mubr.bf16.gmra.mrb[60].mxu1 %v3660_v47  ;;  %1543 = vmatmul.mubr.bf16.gmra.mrb[60].mxu0 %v3661_v48  ;;  %v3708_v18 = vld [vmem:[%s5167_s0 + $0x1d8] ss:$28 sps:$4 sm:$0xff]   ;;  %v3709_v19 = vld [vmem:[%s5167_s0 + $0x2b0] ss:$28 sps:$4 sm:$0xff]   ;;  %v3713_v22 = vld [vmem:[%s5167_s0 + $0x248] ss:$28 sps:$4 sm:$0xff]  }
  0x9b   :  { %1453 = vmatprep.mubr.bf16.mxu1 %v3662_v49  ;;  %1550 = vmatprep.mubr.bf16.mxu0 %v3664_v50  ;;  %v3710_v20 = vld [vmem:[%s5167_s0 + $0x210] ss:$28 sps:$4 sm:$0xff]   ;;  %v3714_v24 = vld [vmem:[%s5167_s0 + $0x2e8] ss:$28 sps:$4 sm:$0xff]   ;;  %v3715_v25 = vld [vmem:[%s5167_s0 + $0x280] ss:$28 sps:$4 sm:$0xff]  }
  0x9c   :  { %v3716_v26 = vld [vmem:[%s5167_s0 + $0x324] ss:$28 sps:$4 sm:$0xff]   ;;  %v3718_v27 = vld [vmem:[%s5167_s0 + $0x2b8] ss:$28 sps:$4 sm:$0xff]   ;;  %v3727_v28 = vld [vmem:[%s5170_s3 + $0x8] sm:$0xff]  }
  0x9d   :  { %v3719_v29 = vld [vmem:[%s5167_s0 + $0x320] ss:$28 sps:$4 sm:$0xff]   ;;  %v3720_v30 = vld [vmem:[%s5167_s0 + $0x2f0] ss:$28 sps:$4 sm:$0xff]   ;;  %v3723_v32 = vld [vmem:[%s5167_s0 + $0x328] ss:$28 sps:$4 sm:$0xff]  }
  0x9e   :  { %v3721_v31 = vld [vmem:[%s5167_s0 + $0x35c] ss:$28 sps:$4 sm:$0xff]   ;;  %v3728_v33 = vld [vmem:[%s5170_s3 + $0x10] sm:$0xff]  }
  0x9f   :  { %v3724_v38 = vld [vmem:[%s5167_s0 + $0x358] ss:$28 sps:$4 sm:$0xff]   ;;  %v3725_v39 = vld [vmem:[%s5167_s0 + $0x360] ss:$28 sps:$4 sm:$0xff]  }
  0xa0   :  { %v3729_v48 = vld [vmem:[%s5170_s3 + $0x18] sm:$0xff]  }
  0xa2   :  { %1454 = vmatmul.mubr.bf16.gmra.mrb[64].mxu1 %v3666_v51  ;;  %1551 = vmatmul.mubr.bf16.gmra.mrb[64].mxu0 %v3667_v52 }
  0xa3   :  { %1461 = vmatprep.mubr.bf16.mxu1 %v3668_v53  ;;  %1558 = vmatprep.mubr.bf16.mxu0 %v3670_v54 }
  0xaa   :  { %1462 = vmatmul.mubr.bf16.gmra.mrb[68].mxu1 %v3672_v55  ;;  %1559 = vmatmul.mubr.bf16.gmra.mrb[68].mxu0 %v3673_v56 }
  0xab   :  { %1469 = vmatprep.mubr.bf16.mxu1 %v3674_v57  ;;  %1566 = vmatprep.mubr.bf16.mxu0 %v3676_v58 }
  0xb2   :  { %1470 = vmatmul.mubr.bf16.gmra.mrb[72].mxu1 %v3678_v59  ;;  %1567 = vmatmul.mubr.bf16.gmra.mrb[72].mxu0 %v3679_v60 }
  0xb3   :  { %1477 = vmatprep.mubr.bf16.mxu1 %v3680_v61  ;;  %1574 = vmatprep.mubr.bf16.mxu0 %v3682_v62  ;;  %v3730_v61 = vld [vmem:[%s5170_s3 + $0x20] sm:$0xff]  }
  0xba   :  { %1478 = vmatmul.mubr.bf16.gmra.mrb[76].mxu1 %v3684_v63  ;;  %1575 = vmatmul.mubr.bf16.gmra.mrb[76].mxu0 %v3685_v0 }
  0xbb   :  { %1582 = vmatprep.mubr.bf16.mxu0 %v3686_v1  ;;  %3370 = vmatprep.mubr.msk.bf16.mxu1 %vm1115_vm0, %v3688_v2 }
  0xc2   :  { %1583 = vmatmul.mubr.bf16.gmra.mrb[80].mxu0 %v3689_v3  ;;  %3371 = vmatmul.mubr.msk.bf16.vlgmr.msra.gmra.mrb[80].mxu1 %vm1115_vm0, %v3690_v4 }
  0xc3   :  { %1590 = vmatprep.mubr.bf16.mxu0 %v3691_v5  ;;  %3374 = vmatprep.mubr.msk.bf16.mxu1 %vm1115_vm0, %v3693_v6 }
  0xc4   :  { %3403 = vmatpush3.bf16.msra.mxu1 %v3726_v23  ;;  %v3732_v23 = vld [vmem:[%s5170_s3 + $0x30] sm:$0xff]  }
  0xc5   :  { %3404 = vmatprep.subr.bf16.mxu1 %v3727_v28 }
  0xc8   :  { %3405 = vmatpush3.bf16.msra.mxu1 %v3727_v28 }
  0xc9   :  { %3406 = vmatprep.subr.bf16.mxu1 %v3728_v33 }
  0xca   :  { %1591 = vmatmul.mubr.bf16.gmra.mrb[84].mxu0 %v3694_v7  ;;  %3375 = vmatmul.mubr.msk.bf16.gmra.mrb[84].mxu1 %vm1115_vm0, %v3695_v8 }
  0xcb   :  { %1598 = vmatprep.mubr.bf16.mxu0 %v3696_v9  ;;  %3378 = vmatprep.mubr.msk.bf16.mxu1 %vm1115_vm0, %v3698_v10  ;;  %v3731_v10 = vld [vmem:[%s5170_s3 + $0x28] sm:$0xff]  }
  0xcc   :  { %3407 = vmatpush3.bf16.msra.mxu1 %v3728_v33 }
  0xcd   :  { %3408 = vmatprep.subr.bf16.mxu1 %v3729_v48 }
  0xd0   :  { %3409 = vmatpush3.bf16.msra.mxu1 %v3729_v48 }
  0xd1   :  { %3410 = vmatprep.subr.bf16.mxu1 %v3730_v61 }
  0xd2   :  { %1599 = vmatmul.mubr.bf16.gmra.mrb[88].mxu0 %v3699_v11  ;;  %3379 = vmatmul.mubr.msk.bf16.gmra.mrb[88].mxu1 %vm1115_vm0, %v3700_v12 }
  0xd3   :  { %1606 = vmatprep.mubr.bf16.mxu0 %v3701_v13  ;;  %3382 = vmatprep.mubr.msk.bf16.mxu1 %vm1115_vm0, %v3703_v14 }
  0xd4   :  { %3411 = vmatpush3.bf16.msra.mxu1 %v3730_v61 }
  0xd5   :  { %3412 = vmatprep.subr.bf16.mxu1 %v3731_v10 }
  0xd8   :  { %3413 = vmatpush3.bf16.msra.mxu1 %v3731_v10 }
  0xd9   :  { %3414 = vmatprep.subr.bf16.mxu1 %v3732_v23 }
  0xda   :  { %1607 = vmatmul.mubr.bf16.gmra.mrb[92].mxu0 %v3704_v15  ;;  %3383 = vmatmul.mubr.msk.bf16.gmra.mrb[92].mxu1 %vm1115_vm0, %v3705_v16 }
  0xdb   :  { %1614 = vmatprep.mubr.bf16.mxu0 %v3706_v17  ;;  %3386 = vmatprep.mubr.msk.bf16.mxu1 %vm1115_vm0, %v3708_v18 }
  0xdc   :  { %3415 = vmatpush3.bf16.msra.mxu1 %v3732_v23 }
  0xe2   :  { %1615 = vmatmul.mubr.bf16.gmra.mrb[96].mxu0 %v3709_v19  ;;  %3387 = vmatmul.mubr.msk.bf16.gmra.mrb[96].mxu1 %vm1115_vm0, %v3710_v20 }
  0xe3   :  { %1622 = vmatprep.mubr.bf16.mxu0 %v3711_v21  ;;  %3390 = vmatprep.mubr.msk.bf16.mxu1 %vm1115_vm0, %v3713_v22 }
  0xea   :  { %1623 = vmatmul.mubr.bf16.gmra.mrb[100].mxu0 %v3714_v24  ;;  %3391 = vmatmul.mubr.msk.bf16.gmra.mrb[100].mxu1 %vm1115_vm0, %v3715_v25  ;;  %v4492_v24 = vld [vmem:[%s5169_s2] ss:$0 sm:$0xff] }
  0xeb   :  { %1630 = vmatprep.mubr.bf16.mxu0 %v3716_v26  ;;  %3394 = vmatprep.mubr.msk.bf16.mxu1 %vm1115_vm0, %v3718_v27 }
  0xf2   :  { %1631 = vmatmul.mubr.bf16.gmra.mrb[104].mxu0 %v3719_v29  ;;  %3395 = vmatmul.mubr.msk.bf16.gmra.mrb[104].mxu1 %vm1115_vm0, %v3720_v30 }
  0xf3   :  { %1638 = vmatprep.mubr.bf16.mxu0 %v3721_v31  ;;  %3398 = vmatprep.mubr.msk.bf16.mxu1 %vm1115_vm0, %v3723_v32 }
  0xf5   :  { %v2983_v34 = vpop.f32.mrb[0].mxu0  ;;  %v3055_v35 = vpop.f32.mrb[0].mxu1 }
  0xf6   :  { %v2984_v36 = vpop.f32.mrb[1].mxu0  ;;  %v3056_v37 = vpop.f32.mrb[1].mxu1 }
  0xf7   :  { %v4444_v40 = vadd.f32 %v2984_v36, %v2983_v34  ;;  %v4446_v41 = vadd.f32 %v3056_v37, %v3055_v35  ;;  %v2986_v42 = vpop.f32.mrb[2].mxu0  ;;  %v3058_v43 = vpop.f32.mrb[2].mxu1 }
  0xf8   :  { %v2987_v44 = vpop.f32.mrb[3].mxu0  ;;  %v3059_v45 = vpop.f32.mrb[3].mxu1 }
  0xf9   :  { %v4448_v46 = vadd.f32 %v2987_v44, %v2986_v42  ;;  %v4450_v47 = vadd.f32 %v3059_v45, %v3058_v43  ;;  %v1199_v29 = vadd.f32 %v4444_v40, %v4492_v24  ;;  %v3733_v42 = vld [vmem:[%s5170_s3 + $0x38] sm:$0xff]  }
  0xfa   :  { %1639 = vmatmul.mubr.bf16.gmra.mrb[108].mxu0 %v3724_v38  ;;  %3399 = vmatmul.mubr.msk.bf16.gmra.mrb[108].mxu1 %vm1115_vm0, %v3725_v39 }
  0xfb   :  { %v1202_v36 = vadd.f32 %v4448_v46, %v4492_v24  ;;  %3416 = vmatprep.subr.bf16.mxu1 %v3733_v42 }
  0xfc   :  { %3417 = vmatpush3.bf16.msra.mxu1 %v3733_v42 }
  0xfd   :  { %v2989_v49 = vpop.f32.mrb[4].mxu0  ;;  %v3061_v50 = vpop.f32.mrb[4].mxu1 }
  0xfe   :  { %v2990_v51 = vpop.f32.mrb[5].mxu0  ;;  %v3062_v52 = vpop.f32.mrb[5].mxu1 }
  0xff   :  { %v4456_v53 = vadd.f32 %v2990_v51, %v2989_v49  ;;  %v4458_v54 = vadd.f32 %v3062_v52, %v3061_v50  ;;  %v2992_v55 = vpop.f32.mrb[6].mxu0  ;;  %v3064_v56 = vpop.f32.mrb[6].mxu1 }
 0x100   :  { %v2993_v57 = vpop.f32.mrb[7].mxu0  ;;  %v3065_v58 = vpop.f32.mrb[7].mxu1 }
 0x101   :  { %v4460_v59 = vadd.f32 %v2993_v57, %v2992_v55  ;;  %v4462_v60 = vadd.f32 %v3065_v58, %v3064_v56  ;;  %v1207_v46 = vadd.f32 %v4456_v53, %v4492_v24 }
 0x103   :  { %v1210_v57 = vadd.f32 %v4460_v59, %v4492_v24 }
 0x105   :  { %v2995_v62 = vpop.f32.mrb[8].mxu0  ;;  %v3067_v63 = vpop.f32.mrb[8].mxu1 }
 0x106   :  { %v2996_v0 = vpop.f32.mrb[9].mxu0  ;;  %v3068_v1 = vpop.f32.mrb[9].mxu1 }
 0x107   :  { %v4467_v2 = vadd.f32 %v2996_v0, %v2995_v62  ;;  %v4469_v3 = vadd.f32 %v3068_v1, %v3067_v63  ;;  %v2998_v4 = vpop.f32.mrb[10].mxu0  ;;  %v3070_v5 = vpop.f32.mrb[10].mxu1 }
 0x108   :  { %v2999_v6 = vpop.f32.mrb[11].mxu0  ;;  %v3071_v7 = vpop.f32.mrb[11].mxu1 }
 0x109   :  { %v4471_v8 = vadd.f32 %v2999_v6, %v2998_v4  ;;  %v4473_v9 = vadd.f32 %v3071_v7, %v3070_v5  ;;  %v1215_v5 = vadd.f32 %v4467_v2, %v4492_v24 }
 0x10d   :  { %v3001_v11 = vpop.f32.mrb[12].mxu0  ;;  %v3073_v12 = vpop.f32.mrb[12].mxu1 }
 0x10e   :  { %v3002_v13 = vpop.f32.mrb[13].mxu0  ;;  %v3074_v14 = vpop.f32.mrb[13].mxu1 }
 0x10f   :  { %v4478_v15 = vadd.f32 %v3002_v13, %v3001_v11  ;;  %v4480_v16 = vadd.f32 %v3074_v14, %v3073_v12  ;;  %v3004_v17 = vpop.f32.mrb[14].mxu0  ;;  %v3076_v18 = vpop.f32.mrb[14].mxu1  ;;  %v1218_v13 = vadd.f32 %v4471_v8, %v4492_v24 }
 0x110   :  { %v3005_v19 = vpop.f32.mrb[15].mxu0  ;;  %v3077_v20 = vpop.f32.mrb[15].mxu1 }
 0x111   :  { %v4482_v21 = vadd.f32 %v3005_v19, %v3004_v17  ;;  %v4484_v22 = vadd.f32 %v3077_v20, %v3076_v18 }
 0x115   :  { %v3007_v25 = vpop.f32.mrb[16].mxu0  ;;  %v3095_v26 = vpop.f32.mrb[16].mxu1 }
 0x116   :  { %v3008_v27 = vpop.f32.mrb[17].mxu0  ;;  %v3096_v28 = vpop.f32.mrb[17].mxu1 }
 0x117   :  { %v4496_v30 = vadd.f32 %v3008_v27, %v3007_v25  ;;  %v3097_v31 = vadd.f32 %v3096_v28, %v3095_v26  ;;  %v3010_v32 = vpop.f32.mrb[18].mxu0  ;;  %v3098_v33 = vpop.f32.mrb[18].mxu1  ;;  %v1223_v26 = vadd.f32 %v4478_v15, %v4492_v24 }
 0x118   :  { %v3011_v34 = vpop.f32.mrb[19].mxu0  ;;  %v3099_v35 = vpop.f32.mrb[19].mxu1 }
 0x119   :  { %v4500_v37 = vadd.f32 %v3097_v31, %v1199_v29  ;;  %v4502_v38 = vadd.f32 %v3011_v34, %v3010_v32  ;;  %v3100_v39 = vadd.f32 %v3099_v35, %v3098_v33  ;;  %v1226_v33 = vadd.f32 %v4482_v21, %v4492_v24 }
 0x11b   :  { %v4507_v40 = vadd.f32 %v3100_v39, %v1202_v36 }
 0x11d   :  { %v3013_v43 = vpop.f32.mrb[20].mxu0  ;;  %v3101_v44 = vpop.f32.mrb[20].mxu1 }
 0x11e   :  { %v3014_v45 = vpop.f32.mrb[21].mxu0  ;;  %v3102_v48 = vpop.f32.mrb[21].mxu1 }
 0x11f   :  { %v4511_v49 = vadd.f32 %v3014_v45, %v3013_v43  ;;  %v3103_v50 = vadd.f32 %v3102_v48, %v3101_v44  ;;  %v3016_v51 = vpop.f32.mrb[22].mxu0  ;;  %v3104_v52 = vpop.f32.mrb[22].mxu1  ;;  %v1231_v45 = vadd.f32 %v4496_v30, %v4492_v24 }
 0x120   :  { %v3017_v55 = vpop.f32.mrb[23].mxu0  ;;  %v3105_v56 = vpop.f32.mrb[23].mxu1 }
 0x121   :  { %v4515_v58 = vadd.f32 %v3103_v50, %v1207_v46  ;;  %v3018_v61 = vadd.f32 %v3017_v55, %v3016_v51  ;;  %v3106_v62 = vadd.f32 %v3105_v56, %v3104_v52  ;;  %v1234_v55 = vadd.f32 %v4502_v38, %v4492_v24 }
 0x123   :  { %v4517_v63 = vadd.f32 %v3106_v62, %v1210_v57 }
 0x125   :  { %v3019_v0 = vpop.f32.mrb[24].mxu0  ;;  %v3107_v1 = vpop.f32.mrb[24].mxu1 }
 0x126   :  { %v3020_v4 = vpop.f32.mrb[25].mxu0  ;;  %v3108_v53 = vpop.f32.mrb[25].mxu1 }
 0x127   :  { %v4521_v6 = vadd.f32 %v3020_v4, %v3019_v0  ;;  %v3109_v7 = vadd.f32 %v3108_v53, %v3107_v1  ;;  %v3022_v10 = vpop.f32.mrb[26].mxu0  ;;  %v3110_v11 = vpop.f32.mrb[26].mxu1 }
 0x128   :  { %v3023_v12 = vpop.f32.mrb[27].mxu0  ;;  %v3111_v59 = vpop.f32.mrb[27].mxu1 }
 0x129   :  { %v4525_v14 = vadd.f32 %v3109_v7, %v1215_v5  ;;  %v3024_v17 = vadd.f32 %v3023_v12, %v3022_v10  ;;  %v3112_v18 = vadd.f32 %v3111_v59, %v3110_v11  ;;  %v1239_v5 = vadd.f32 %v4511_v49, %v4492_v24 }
 0x12b   :  { %v4527_v19 = vadd.f32 %v3112_v18, %v1218_v13  ;;  %v1242_v13 = vadd.f32 %v3018_v61, %v4492_v24 }
 0x12d   :  { %v3025_v20 = vpop.f32.mrb[28].mxu0  ;;  %v3113_v23 = vpop.f32.mrb[28].mxu1 }
 0x12e   :  { %v3026_v25 = vpop.f32.mrb[29].mxu0  ;;  %v3114_v2 = vpop.f32.mrb[29].mxu1 }
 0x12f   :  { %v4531_v27 = vadd.f32 %v3026_v25, %v3025_v20  ;;  %v3115_v28 = vadd.f32 %v3114_v2, %v3113_v23  ;;  %v3028_v29 = vpop.f32.mrb[30].mxu0  ;;  %v3116_v31 = vpop.f32.mrb[30].mxu1 }
 0x130   :  { %v3029_v32 = vpop.f32.mrb[31].mxu0  ;;  %v3117_v8 = vpop.f32.mrb[31].mxu1 }
 0x131   :  { %v4535_v34 = vadd.f32 %v3115_v28, %v1223_v26  ;;  %v3030_v35 = vadd.f32 %v3029_v32, %v3028_v29  ;;  %v3118_v36 = vadd.f32 %v3117_v8, %v3116_v31  ;;  %v1247_v29 = vadd.f32 %v4521_v6, %v4492_v24 }
 0x133   :  { %v4537_v39 = vadd.f32 %v3118_v36, %v1226_v33 }
 0x135   :  { %v3031_v42 = vpop.f32.mrb[32].mxu0  ;;  %v3119_v43 = vpop.f32.mrb[32].mxu1 }
 0x136   :  { %v3032_v44 = vpop.f32.mrb[33].mxu0  ;;  %v3120_v15 = vpop.f32.mrb[33].mxu1 }
 0x137   :  { %v4541_v48 = vadd.f32 %v3032_v44, %v3031_v42  ;;  %v3121_v46 = vadd.f32 %v3120_v15, %v3119_v43  ;;  %v3034_v50 = vpop.f32.mrb[34].mxu0  ;;  %v3122_v51 = vpop.f32.mrb[34].mxu1  ;;  %v1250_v42 = vadd.f32 %v3024_v17, %v4492_v24 }
 0x138   :  { %v3035_v52 = vpop.f32.mrb[35].mxu0  ;;  %v3123_v21 = vpop.f32.mrb[35].mxu1 }
 0x139   :  { %v4545_v56 = vadd.f32 %v3121_v46, %v1231_v45  ;;  %v3036_v57 = vadd.f32 %v3035_v52, %v3034_v50  ;;  %v3124_v62 = vadd.f32 %v3123_v21, %v3122_v51  ;;  %v1255_v52 = vadd.f32 %v4531_v27, %v4492_v24 }
 0x13b   :  { %v4547_v0 = vadd.f32 %v3124_v62, %v1234_v55 }
 0x13d   :  { %v3037_v1 = vpop.f32.mrb[36].mxu0  ;;  %v3125_v4 = vpop.f32.mrb[36].mxu1 }
 0x13e   :  { %v3038_v53 = vpop.f32.mrb[37].mxu0  ;;  %v3126_v30 = vpop.f32.mrb[37].mxu1 }
 0x13f   :  { %v4551_v7 = vadd.f32 %v3038_v53, %v3037_v1  ;;  %v3127_v10 = vadd.f32 %v3126_v30, %v3125_v4  ;;  %v3040_v11 = vpop.f32.mrb[38].mxu0  ;;  %v3128_v12 = vpop.f32.mrb[38].mxu1  ;;  %v1258_v53 = vadd.f32 %v3030_v35, %v4492_v24  ;;  %v1266_v35 = vadd.f32 %v3036_v57, %v4492_v24  ;;  %v3735_v57 = vld [vmem:[%s5172_s5 + $0x8] sm:$0xff]  }
 0x140   :  { %v3041_v59 = vpop.f32.mrb[39].mxu0  ;;  %v3129_v38 = vpop.f32.mrb[39].mxu1 }
 0x141   :  { %v4554_v18 = vadd.f32 %v3127_v10, %v1239_v5  ;;  %v4556_v20 = vadd.f32 %v3041_v59, %v3040_v11  ;;  %v3130_v23 = vadd.f32 %v3129_v38, %v3128_v12 }
 0x143   :  { %v4558_v25 = vadd.f32 %v3130_v23, %v1242_v13  ;;  %v1263_v13 = vadd.f32 %v4541_v48, %v4492_v24  ;;  %v3734_v48 = vld [vmem:[%s5172_s5] sm:$0xff]  }
 0x144   :  { %3450 = vmatprep.subr.bf16.mxu0 %v3734_v48 }
 0x145   :  { %v3043_v2 = vpop.f32.mrb[40].mxu0  ;;  %v3131_v26 = vpop.f32.mrb[40].mxu1  ;;  %3451 = vmatpush3.bf16.msra.mxu0 %v3734_v48 }
 0x146   :  { %v3044_v28 = vpop.f32.mrb[41].mxu0  ;;  %v3132_v49 = vpop.f32.mrb[41].mxu1  ;;  %3452 = vmatprep.subr.bf16.mxu0 %v3735_v57 }
 0x147   :  { %v4562_v31 = vadd.f32 %v3044_v28, %v3043_v2  ;;  %v3133_v32 = vadd.f32 %v3132_v49, %v3131_v26  ;;  %v3046_v8 = vpop.f32.mrb[42].mxu0  ;;  %v3134_v33 = vpop.f32.mrb[42].mxu1 }
 0x148   :  { %v3047_v61 = vpop.f32.mrb[43].mxu0  ;;  %v3135_v36 = vpop.f32.mrb[43].mxu1 }
 0x149   :  { %v4565_v43 = vadd.f32 %v3133_v32, %v1247_v29  ;;  %v4567_v44 = vadd.f32 %v3047_v61, %v3046_v8  ;;  %v3136_v15 = vadd.f32 %v3135_v36, %v3134_v33  ;;  %3453 = vmatpush3.bf16.msra.mxu0 %v3735_v57 }
 0x14b   :  { %v4569_v45 = vadd.f32 %v3136_v15, %v1250_v42 }
 0x14d   :  { %v3049_v46 = vpop.f32.mrb[44].mxu0  ;;  %v3137_v50 = vpop.f32.mrb[44].mxu1 }
 0x14e   :  { %v3050_v51 = vpop.f32.mrb[45].mxu0  ;;  %v3138_v6 = vpop.f32.mrb[45].mxu1 }
 0x14f   :  { %v4573_v21 = vadd.f32 %v3050_v51, %v3049_v46  ;;  %v3139_v55 = vadd.f32 %v3138_v6, %v3137_v50  ;;  %v3052_v62 = vpop.f32.mrb[46].mxu0  ;;  %v3140_v1 = vpop.f32.mrb[46].mxu1 }
 0x150   :  { %v3053_v17 = vpop.f32.mrb[47].mxu0  ;;  %v3141_v4 = vpop.f32.mrb[47].mxu1 }
 0x151   :  { %v4576_v30 = vadd.f32 %v3139_v55, %v1255_v52  ;;  %v4578_v5 = vadd.f32 %v3053_v17, %v3052_v62  ;;  %v3142_v10 = vadd.f32 %v3141_v4, %v3140_v1  ;;  %v3736_v62 = vld [vmem:[%s5172_s5 + $0x10] sm:$0xff]   ;;  %v1274_v1 = vadd.f32 %v4556_v20, %v4492_v24  ;;  %v3737_v20 = vld [vmem:[%s5172_s5 + $0x18] sm:$0xff]  }
 0x152   :  { %3454 = vmatprep.subr.bf16.mxu0 %v3736_v62 }
 0x153   :  { %v4580_v11 = vadd.f32 %v3142_v10, %v1258_v53  ;;  %3455 = vmatpush3.bf16.msra.mxu0 %v3736_v62 }
 0x154   :  { %3456 = vmatprep.subr.bf16.mxu0 %v3737_v20 }
 0x155   :  { %v3143_v12 = vpop.f32.mrb[48].mxu1  ;;  %v3207_v59 = vpop.f32.mrb[48].mxu0 }
 0x156   :  { %v3144_v38 = vpop.f32.mrb[49].mxu1  ;;  %v3208_v27 = vpop.f32.mrb[49].mxu0 }
 0x157   :  { %v3145_v23 = vadd.f32 %v3144_v38, %v3143_v12  ;;  %v3209_v2 = vadd.f32 %v3208_v27, %v3207_v59  ;;  %v3146_v26 = vpop.f32.mrb[50].mxu1  ;;  %v3210_v28 = vpop.f32.mrb[50].mxu0  ;;  %3457 = vmatpush3.bf16.msra.mxu0 %v3737_v20 }
 0x158   :  { %v3147_v49 = vpop.f32.mrb[51].mxu1  ;;  %v3211_v29 = vpop.f32.mrb[51].mxu0 }
 0x159   :  { %v4585_v32 = vadd.f32 %v3145_v23, %v1263_v13  ;;  %v3148_v8 = vadd.f32 %v3147_v49, %v3146_v26  ;;  %v3212_v33 = vadd.f32 %v3211_v29, %v3210_v28  ;;  %v4588_v61 = vadd.f32 %v3209_v2, %v4500_v37 }
 0x15a   :  { %v1271_v37 = vadd.f32 %v4551_v7, %v4492_v24  ;;  %v1282_v29 = vadd.f32 %v4567_v44, %v4492_v24  ;;  %v3739_v44 = vld [vmem:[%s5172_s5 + $0x28] sm:$0xff]  }
 0x15b   :  { %v4590_v36 = vadd.f32 %v3148_v8, %v1266_v35  ;;  %v4593_v42 = vadd.f32 %v3212_v33, %v4507_v40 }
 0x15d   :  { %v3149_v15 = vpop.f32.mrb[52].mxu1  ;;  %v3213_v46 = vpop.f32.mrb[52].mxu0 }
 0x15e   :  { %v3150_v50 = vpop.f32.mrb[53].mxu1  ;;  %v3214_v51 = vpop.f32.mrb[53].mxu0 }
 0x15f   :  { %v3151_v6 = vadd.f32 %v3150_v50, %v3149_v15  ;;  %v3215_v40 = vadd.f32 %v3214_v51, %v3213_v46  ;;  %v3152_v52 = vpop.f32.mrb[54].mxu1  ;;  %v3216_v55 = vpop.f32.mrb[54].mxu0 }
 0x160   :  { %v3153_v17 = vpop.f32.mrb[55].mxu1  ;;  %v3217_v4 = vpop.f32.mrb[55].mxu0 }
 0x161   :  { %v4608_v53 = vadd.f32 %v3151_v6, %v1271_v37  ;;  %v3154_v10 = vadd.f32 %v3153_v17, %v3152_v52  ;;  %v3218_v12 = vadd.f32 %v3217_v4, %v3216_v55  ;;  %v4611_v7 = vadd.f32 %v3215_v40, %v4515_v58 }
 0x162   :  { %v1279_v58 = vadd.f32 %v4562_v31, %v4492_v24  ;;  %v1290_v17 = vadd.f32 %v4578_v5, %v4492_v24  ;;  %v3741_v5 = vld [vmem:[%s5172_s5 + $0x38] sm:$0xff]  }
 0x163   :  { %v4613_v59 = vadd.f32 %v3154_v10, %v1274_v1  ;;  %v4616_v38 = vadd.f32 %v3218_v12, %v4517_v63  ;;  %v3738_v63 = vld [vmem:[%s5172_s5 + $0x20] sm:$0xff]  }
 0x164   :  { %3458 = vmatprep.subr.bf16.mxu0 %v3738_v63 }
 0x165   :  { %v3155_v27 = vpop.f32.mrb[56].mxu1  ;;  %v3219_v13 = vpop.f32.mrb[56].mxu0  ;;  %3459 = vmatpush3.bf16.msra.mxu0 %v3738_v63 }
 0x166   :  { %v3156_v23 = vpop.f32.mrb[57].mxu1  ;;  %v3220_v2 = vpop.f32.mrb[57].mxu0  ;;  %3460 = vmatprep.subr.bf16.mxu0 %v3739_v44 }
 0x167   :  { %v3157_v26 = vadd.f32 %v3156_v23, %v3155_v27  ;;  %v3221_v28 = vadd.f32 %v3220_v2, %v3219_v13  ;;  %v3158_v35 = vpop.f32.mrb[58].mxu1  ;;  %v3222_v49 = vpop.f32.mrb[58].mxu0 }
 0x168   :  { %v3159_v8 = vpop.f32.mrb[59].mxu1  ;;  %v3223_v33 = vpop.f32.mrb[59].mxu0 }
 0x169   :  { %v4628_v48 = vadd.f32 %v3157_v26, %v1279_v58  ;;  %v3160_v57 = vadd.f32 %v3159_v8, %v3158_v35  ;;  %v3224_v15 = vadd.f32 %v3223_v33, %v3222_v49  ;;  %v4631_v31 = vadd.f32 %v3221_v28, %v4525_v14  ;;  %3461 = vmatpush3.bf16.msra.mxu0 %v3739_v44 }
 0x16a   :  { %v1287_v14 = vadd.f32 %v4573_v21, %v4492_v24 }
 0x16b   :  { %v4633_v46 = vadd.f32 %v3160_v57, %v1282_v29  ;;  %v4636_v50 = vadd.f32 %v3224_v15, %v4527_v19  ;;  %v3740_v19 = vld [vmem:[%s5172_s5 + $0x30] sm:$0xff]  }
 0x16c   :  { %3462 = vmatprep.subr.bf16.mxu0 %v3740_v19 }
 0x16d   :  { %v3161_v51 = vpop.f32.mrb[60].mxu1  ;;  %v3225_v37 = vpop.f32.mrb[60].mxu0  ;;  %3463 = vmatpush3.bf16.msra.mxu0 %v3740_v19 }
 0x16e   :  { %v3162_v6 = vpop.f32.mrb[61].mxu1  ;;  %v3226_v40 = vpop.f32.mrb[61].mxu0  ;;  %3464 = vmatprep.subr.bf16.mxu0 %v3741_v5 }
 0x16f   :  { %v3163_v52 = vadd.f32 %v3162_v6, %v3161_v51  ;;  %v3227_v55 = vadd.f32 %v3226_v40, %v3225_v37  ;;  %v3164_v62 = vpop.f32.mrb[62].mxu1  ;;  %v3228_v1 = vpop.f32.mrb[62].mxu0 }
 0x170   :  { %v3165_v4 = vpop.f32.mrb[63].mxu1  ;;  %v3229_v10 = vpop.f32.mrb[63].mxu0 }
 0x171   :  { %v4648_v12 = vadd.f32 %v3163_v52, %v1287_v14  ;;  %v3166_v20 = vadd.f32 %v3165_v4, %v3164_v62  ;;  %v3230_v27 = vadd.f32 %v3229_v10, %v3228_v1  ;;  %v4651_v21 = vadd.f32 %v3227_v55, %v4535_v34  ;;  %3465 = vmatpush3.bf16.msra.mxu0 %v3741_v5 }
 0x172   :  { %v1295_v34 = vadd.f32 %v4446_v41, %v4492_v24 }
 0x173   :  { %v4653_v13 = vadd.f32 %v3166_v20, %v1290_v17  ;;  %v4656_v23 = vadd.f32 %v3230_v27, %v4537_v39  ;;  %v1298_v39 = vadd.f32 %v4450_v47, %v4492_v24  ;;  %v1303_v47 = vadd.f32 %v4458_v54, %v4492_v24 }
 0x175   :  { %v3167_v2 = vpop.f32.mrb[64].mxu1  ;;  %v3231_v58 = vpop.f32.mrb[64].mxu0 }
 0x176   :  { %v3168_v26 = vpop.f32.mrb[65].mxu1  ;;  %v3232_v28 = vpop.f32.mrb[65].mxu0 }
 0x177   :  { %v3169_v35 = vadd.f32 %v3168_v26, %v3167_v2  ;;  %v3233_v49 = vadd.f32 %v3232_v28, %v3231_v58  ;;  %v3170_v63 = vpop.f32.mrb[66].mxu1  ;;  %v3234_v29 = vpop.f32.mrb[66].mxu0 }
 0x178   :  { %v3171_v8 = vpop.f32.mrb[67].mxu1  ;;  %v3235_v33 = vpop.f32.mrb[67].mxu0 }
 0x179   :  { %v4665_v57 = vadd.f32 %v3169_v35, %v1295_v34  ;;  %v3172_v15 = vadd.f32 %v3171_v8, %v3170_v63  ;;  %v3236_v44 = vadd.f32 %v3235_v33, %v3234_v29  ;;  %v4668_v51 = vadd.f32 %v3233_v49, %v4545_v56 }
 0x17a   :  { %v1306_v56 = vadd.f32 %v4462_v60, %v4492_v24  ;;  %v1311_v60 = vadd.f32 %v4469_v3, %v4492_v24 }
 0x17b   :  { %v4670_v37 = vadd.f32 %v3172_v15, %v1298_v39  ;;  %v4673_v41 = vadd.f32 %v3236_v44, %v4547_v0 }
 0x17d   :  { %v3173_v6 = vpop.f32.mrb[68].mxu1  ;;  %v3237_v40 = vpop.f32.mrb[68].mxu0 }
 0x17e   :  { %v3174_v14 = vpop.f32.mrb[69].mxu1  ;;  %v3238_v52 = vpop.f32.mrb[69].mxu0 }
 0x17f   :  { %v3175_v55 = vadd.f32 %v3174_v14, %v3173_v6  ;;  %v3239_v62 = vadd.f32 %v3238_v52, %v3237_v40  ;;  %v3176_v1 = vpop.f32.mrb[70].mxu1  ;;  %v3240_v19 = vpop.f32.mrb[70].mxu0 }
 0x180   :  { %v3177_v17 = vpop.f32.mrb[71].mxu1  ;;  %v3241_v4 = vpop.f32.mrb[71].mxu0 }
 0x181   :  { %v4679_v10 = vadd.f32 %v3175_v55, %v1303_v47  ;;  %v3178_v0 = vadd.f32 %v3177_v17, %v3176_v1  ;;  %v3242_v20 = vadd.f32 %v3241_v4, %v3240_v19  ;;  %v4682_v27 = vadd.f32 %v3239_v62, %v4554_v18 }
 0x182   :  { %v1314_v18 = vadd.f32 %v4473_v9, %v4492_v24  ;;  %v1319_v9 = vadd.f32 %v4480_v16, %v4492_v24 }
 0x183   :  { %v4684_v5 = vadd.f32 %v3178_v0, %v1306_v56  ;;  %v4687_v54 = vadd.f32 %v3242_v20, %v4558_v25 }
 0x185   :  { %v3179_v2 = vpop.f32.mrb[72].mxu1  ;;  %v3243_v58 = vpop.f32.mrb[72].mxu0 }
 0x186   :  { %v3180_v26 = vpop.f32.mrb[73].mxu1  ;;  %v3244_v28 = vpop.f32.mrb[73].mxu0 }
 0x187   :  { %v3181_v34 = vadd.f32 %v3180_v26, %v3179_v2  ;;  %v3245_v35 = vadd.f32 %v3244_v28, %v3243_v58  ;;  %v3182_v49 = vpop.f32.mrb[74].mxu1  ;;  %v3246_v63 = vpop.f32.mrb[74].mxu0 }
 0x188   :  { %v3183_v29 = vpop.f32.mrb[75].mxu1  ;;  %v3247_v39 = vpop.f32.mrb[75].mxu0 }
 0x189   :  { %v4693_v8 = vadd.f32 %v3181_v34, %v1311_v60  ;;  %v3184_v25 = vadd.f32 %v3183_v29, %v3182_v49  ;;  %v3248_v33 = vadd.f32 %v3247_v39, %v3246_v63  ;;  %v4696_v15 = vadd.f32 %v3245_v35, %v4565_v43 }
 0x18a   :  { %v1322_v43 = vadd.f32 %v4484_v22, %v4492_v24 }
 0x18b   :  { %v4698_v44 = vadd.f32 %v3184_v25, %v1314_v18  ;;  %v4701_v3 = vadd.f32 %v3248_v33, %v4569_v45 }
 0x18d   :  { %v3185_v6 = vpop.f32.mrb[76].mxu1  ;;  %v3249_v40 = vpop.f32.mrb[76].mxu0 }
 0x18e   :  { %v3186_v14 = vpop.f32.mrb[77].mxu1  ;;  %v3250_v52 = vpop.f32.mrb[77].mxu0 }
 0x18f   :  { %v3187_v47 = vadd.f32 %v3186_v14, %v3185_v6  ;;  %v3251_v55 = vadd.f32 %v3250_v52, %v3249_v40  ;;  %v3188_v62 = vpop.f32.mrb[78].mxu1  ;;  %v3252_v1 = vpop.f32.mrb[78].mxu0 }
 0x190   :  { %v3189_v19 = vpop.f32.mrb[79].mxu1  ;;  %v3253_v56 = vpop.f32.mrb[79].mxu0 }
 0x191   :  { %v4707_v17 = vadd.f32 %v3187_v47, %v1319_v9  ;;  %v3190_v45 = vadd.f32 %v3189_v19, %v3188_v62  ;;  %v3254_v4 = vadd.f32 %v3253_v56, %v3252_v1  ;;  %v4710_v0 = vadd.f32 %v3251_v55, %v4576_v30 }
 0x193   :  { %v4712_v20 = vadd.f32 %v3190_v45, %v1322_v43  ;;  %v4715_v16 = vadd.f32 %v3254_v4, %v4580_v11 }
 0x195   :  { %v3255_v2 = vpop.f32.mrb[80].mxu0  ;;  %v3372_v58 = vpop.f32.mrb[80].mxu1 }
 0x196   :  { %v1690_v26 = vadd.f32 %v3372_v58, %v4611_v7  ;;  %v3256_v28 = vpop.f32.mrb[81].mxu0  ;;  %v1681_v22 = vpop.f32.mrb[81].mxu1 }
 0x197   :  { %v3257_v24 = vadd.f32 %v3256_v28, %v3255_v2  ;;  %v1682_v60 = vadd.f32 %v1681_v22, %v4588_v61  ;;  %v3258_v34 = vpop.f32.mrb[82].mxu0  ;;  %v3373_v35 = vpop.f32.mrb[82].mxu1 }
 0x198   :  { %v1693_v49 = vadd.f32 %v3373_v35, %v4616_v38  ;;  %v3259_v30 = vpop.f32.mrb[83].mxu0  ;;  %v1684_v63 = vpop.f32.mrb[83].mxu1  ;;  %v1810_v39 = vmax.f32 %v1690_v26, 0.0 }
 0x199   :  { %v3260_v18 = vadd.f32 %v3259_v30, %v3258_v34  ;;  %v1685_v29 = vadd.f32 %v1684_v63, %v4593_v42  ;;  %v4722_v11 = vadd.f32 %v3257_v24, %v4585_v32  ;;  %v1808_v7 = vmax.f32 %v1682_v60, 0.0 }
 0x19a   :  { %v1811_v25 = vmax.f32 %v1693_v49, 0.0 }
 0x19b   :  { %v1809_v33 = vmax.f32 %v1685_v29, 0.0  ;;  %v4725_v6 = vadd.f32 %v3260_v18, %v4590_v36 }
 0x19c   :  { %v1841_v61 = vpack.c.bf16 %v1811_v25, %v1810_v39 }
 0x19d   :  { %v1840_v40 = vpack.c.bf16 %v1809_v33, %v1808_v7  ;;  %v3261_v14 = vpop.f32.mrb[84].mxu0  ;;  %v3376_v52 = vpop.f32.mrb[84].mxu1 }
 0x19e   :  { %v1706_v38 = vadd.f32 %v3376_v52, %v4651_v21  ;;  %v3262_v9 = vpop.f32.mrb[85].mxu0  ;;  %v1697_v47 = vpop.f32.mrb[85].mxu1 }
 0x19f   :  { %v3263_v55 = vadd.f32 %v3262_v9, %v3261_v14  ;;  %v1698_v42 = vadd.f32 %v1697_v47, %v4631_v31  ;;  %v3264_v32 = vpop.f32.mrb[86].mxu0  ;;  %v3377_v62 = vpop.f32.mrb[86].mxu1  ;;  %3418 = vmatprep.mubr.bf16.mxu1 %v1840_v40 }
 0x1a0   :  { %v1709_v1 = vadd.f32 %v3377_v62, %v4656_v23  ;;  %v3265_v43 = vpop.f32.mrb[87].mxu0  ;;  %v1700_v19 = vpop.f32.mrb[87].mxu1  ;;  %3419 = vmatmul.mubr.bf16.vlgmr.msra.gmra.mrb[112].mxu1 %v1841_v61  ;;  %v1814_v4 = vmax.f32 %v1706_v38, 0.0 }
 0x1a1   :  { %v3266_v36 = vadd.f32 %v3265_v43, %v3264_v32  ;;  %v1701_v56 = vadd.f32 %v1700_v19, %v4636_v50  ;;  %v1593_v45 = vadd.f32 %v3263_v55, %v4608_v53  ;;  %v1812_v2 = vmax.f32 %v1698_v42, 0.0 }
 0x1a2   :  { %v1815_v21 = vmax.f32 %v1709_v1, 0.0 }
 0x1a3   :  { %v1813_v58 = vmax.f32 %v1701_v56, 0.0  ;;  %v1596_v26 = vadd.f32 %v3266_v36, %v4613_v59 }
 0x1a4   :  { %v1843_v31 = vpack.c.bf16 %v1815_v21, %v1814_v4 }
 0x1a5   :  { %v1842_v28 = vpack.c.bf16 %v1813_v58, %v1812_v2  ;;  %v3267_v22 = vpop.f32.mrb[88].mxu0  ;;  %v3380_v24 = vpop.f32.mrb[88].mxu1 }
 0x1a6   :  { %v1722_v23 = vadd.f32 %v3380_v24, %v4682_v27  ;;  %v3268_v60 = vpop.f32.mrb[89].mxu0  ;;  %v1713_v34 = vpop.f32.mrb[89].mxu1 }
 0x1a7   :  { %v3269_v35 = vadd.f32 %v3268_v60, %v3267_v22  ;;  %v1714_v49 = vadd.f32 %v1713_v34, %v4668_v51  ;;  %v3270_v50 = vpop.f32.mrb[90].mxu0  ;;  %v3381_v30 = vpop.f32.mrb[90].mxu1  ;;  %3422 = vmatprep.mubr.bf16.mxu1 %v1842_v28 }
 0x1a8   :  { %v1725_v53 = vadd.f32 %v3381_v30, %v4687_v54  ;;  %v3271_v63 = vpop.f32.mrb[91].mxu0  ;;  %v1716_v18 = vpop.f32.mrb[91].mxu1  ;;  %3423 = vmatmul.mubr.bf16.gmra.mrb[116].mxu1 %v1843_v31  ;;  %v1818_v25 = vmax.f32 %v1722_v23, 0.0 }
 0x1a9   :  { %v3272_v59 = vadd.f32 %v3271_v63, %v3270_v50  ;;  %v1717_v29 = vadd.f32 %v1716_v18, %v4673_v41  ;;  %v1601_v39 = vadd.f32 %v3269_v35, %v4628_v48  ;;  %v1816_v7 = vmax.f32 %v1714_v49, 0.0 }
 0x1aa   :  { %v1819_v27 = vmax.f32 %v1725_v53, 0.0 }
 0x1ab   :  { %v1817_v33 = vmax.f32 %v1717_v29, 0.0  ;;  %v4739_v61 = vadd.f32 %v3272_v59, %v4633_v46 }
 0x1ac   :  { %v1845_v51 = vpack.c.bf16 %v1819_v27, %v1818_v25 }
 0x1ad   :  { %v1844_v40 = vpack.c.bf16 %v1817_v33, %v1816_v7  ;;  %v3273_v14 = vpop.f32.mrb[92].mxu0  ;;  %v3384_v52 = vpop.f32.mrb[92].mxu1 }
 0x1ae   :  { %v1738_v54 = vadd.f32 %v3384_v52, %v4710_v0  ;;  %v3274_v38 = vpop.f32.mrb[93].mxu0  ;;  %v1729_v9 = vpop.f32.mrb[93].mxu1 }
 0x1af   :  { %v3275_v47 = vadd.f32 %v3274_v38, %v3273_v14  ;;  %v1730_v41 = vadd.f32 %v1729_v9, %v4696_v15  ;;  %v3276_v55 = vpop.f32.mrb[94].mxu0  ;;  %v3385_v48 = vpop.f32.mrb[94].mxu1  ;;  %3426 = vmatprep.mubr.bf16.mxu1 %v1844_v40 }
 0x1b0   :  { %v1741_v42 = vadd.f32 %v3385_v48, %v4715_v16  ;;  %v3277_v32 = vpop.f32.mrb[95].mxu0  ;;  %v1732_v62 = vpop.f32.mrb[95].mxu1  ;;  %3427 = vmatmul.mubr.bf16.gmra.mrb[120].mxu1 %v1845_v51  ;;  %v1822_v19 = vmax.f32 %v1738_v54, 0.0 }
 0x1b1   :  { %v3278_v46 = vadd.f32 %v3277_v32, %v3276_v55  ;;  %v1733_v1 = vadd.f32 %v1732_v62, %v4701_v3  ;;  %v1609_v43 = vadd.f32 %v3275_v47, %v4648_v12  ;;  %v1820_v36 = vmax.f32 %v1730_v41, 0.0 }
 0x1b2   :  { %v1823_v0 = vmax.f32 %v1741_v42, 0.0 }
 0x1b3   :  { %v1821_v56 = vmax.f32 %v1733_v1, 0.0  ;;  %v1612_v4 = vadd.f32 %v3278_v46, %v4653_v13 }
 0x1b4   :  { %v1847_v15 = vpack.c.bf16 %v1823_v0, %v1822_v19 }
 0x1b5   :  { %v1846_v21 = vpack.c.bf16 %v1821_v56, %v1820_v36  ;;  %v3279_v2 = vpop.f32.mrb[96].mxu0  ;;  %v3388_v58 = vpop.f32.mrb[96].mxu1 }
 0x1b6   :  { %v1754_v31 = vadd.f32 %v3388_v58, %v1593_v45  ;;  %v3280_v16 = vpop.f32.mrb[97].mxu0  ;;  %v1745_v28 = vpop.f32.mrb[97].mxu1 }
 0x1b7   :  { %v3281_v22 = vadd.f32 %v3280_v16, %v3279_v2  ;;  %v1746_v24 = vadd.f32 %v1745_v28, %v4722_v11  ;;  %v3282_v23 = vpop.f32.mrb[98].mxu0  ;;  %v3389_v3 = vpop.f32.mrb[98].mxu1  ;;  %3430 = vmatprep.mubr.bf16.mxu1 %v1846_v21 }
 0x1b8   :  { %v1757_v12 = vadd.f32 %v3389_v3, %v1596_v26  ;;  %v3283_v60 = vpop.f32.mrb[99].mxu0  ;;  %v1748_v34 = vpop.f32.mrb[99].mxu1  ;;  %3431 = vmatmul.mubr.bf16.gmra.mrb[124].mxu1 %v1847_v15  ;;  %v1826_v50 = vmax.f32 %v1754_v31, 0.0 }
 0x1b9   :  { %v3284_v35 = vadd.f32 %v3283_v60, %v3282_v23  ;;  %v1749_v13 = vadd.f32 %v1748_v34, %v4725_v6  ;;  %v1617_v49 = vadd.f32 %v3281_v22, %v4665_v57  ;;  %v1824_v45 = vmax.f32 %v1746_v24, 0.0 }
 0x1ba   :  { %v1827_v30 = vmax.f32 %v1757_v12, 0.0 }
 0x1bb   :  { %v1825_v53 = vmax.f32 %v1749_v13, 0.0  ;;  %v1620_v63 = vadd.f32 %v3284_v35, %v4670_v37 }
 0x1bc   :  { %v1849_v18 = vpack.c.bf16 %v1827_v30, %v1826_v50 }
 0x1bd   :  { %v1848_v11 = vpack.c.bf16 %v1825_v53, %v1824_v45  ;;  %v3285_v59 = vpop.f32.mrb[100].mxu0  ;;  %v3392_v29 = vpop.f32.mrb[100].mxu1 }
 0x1be   :  { %v1770_v25 = vadd.f32 %v3392_v29, %v1609_v43  ;;  %v3286_v26 = vpop.f32.mrb[101].mxu0  ;;  %v1761_v27 = vpop.f32.mrb[101].mxu1 }
 0x1bf   :  { %v3287_v7 = vadd.f32 %v3286_v26, %v3285_v59  ;;  %v1762_v33 = vadd.f32 %v1761_v27, %v1601_v39  ;;  %v3288_v51 = vpop.f32.mrb[102].mxu0  ;;  %v3393_v40 = vpop.f32.mrb[102].mxu1  ;;  %3434 = vmatprep.mubr.bf16.mxu1 %v1848_v11  ;;  %v4761_v27 = vld [vmem:[%s5171_s4] ss:$0 sm:$0xff] }
 0x1c0   :  { %v1773_v6 = vadd.f32 %v3393_v40, %v1612_v4  ;;  %v3289_v57 = vpop.f32.mrb[103].mxu0  ;;  %v1764_v14 = vpop.f32.mrb[103].mxu1  ;;  %3435 = vmatmul.mubr.bf16.gmra.mrb[128].mxu1 %v1849_v18  ;;  %v1830_v38 = vmax.f32 %v1770_v25, 0.0 }
 0x1c1   :  { %v3290_v52 = vadd.f32 %v3289_v57, %v3288_v51  ;;  %v1765_v54 = vadd.f32 %v1764_v14, %v4739_v61  ;;  %v1625_v37 = vadd.f32 %v3287_v7, %v4679_v10  ;;  %v1828_v47 = vmax.f32 %v1762_v33, 0.0 }
 0x1c2   :  { %v1831_v9 = vmax.f32 %v1773_v6, 0.0 }
 0x1c3   :  { %v1829_v41 = vmax.f32 %v1765_v54, 0.0  ;;  %v1628_v55 = vadd.f32 %v3290_v52, %v4684_v5 }
 0x1c4   :  { %v1851_v48 = vpack.c.bf16 %v1831_v9, %v1830_v38 }
 0x1c5   :  { %v1850_v39 = vpack.c.bf16 %v1829_v41, %v1828_v47  ;;  %v3291_v42 = vpop.f32.mrb[104].mxu0  ;;  %v3396_v32 = vpop.f32.mrb[104].mxu1 }
 0x1c6   :  { %v1786_v62 = vadd.f32 %v3396_v32, %v1625_v37  ;;  %v3292_v46 = vpop.f32.mrb[105].mxu0  ;;  %v1777_v1 = vpop.f32.mrb[105].mxu1 }
 0x1c7   :  { %v3293_v43 = vadd.f32 %v3292_v46, %v3291_v42  ;;  %v1778_v19 = vadd.f32 %v1777_v1, %v1617_v49  ;;  %v3294_v0 = vpop.f32.mrb[106].mxu0  ;;  %v3397_v36 = vpop.f32.mrb[106].mxu1  ;;  %3438 = vmatprep.mubr.bf16.mxu1 %v1850_v39 }
 0x1c8   :  { %v1789_v61 = vadd.f32 %v3397_v36, %v1628_v55  ;;  %v3295_v10 = vpop.f32.mrb[107].mxu0  ;;  %v1780_v56 = vpop.f32.mrb[107].mxu1  ;;  %3439 = vmatmul.mubr.bf16.gmra.mrb[132].mxu1 %v1851_v48  ;;  %v1834_v21 = vmax.f32 %v1786_v62, 0.0 }
 0x1c9   :  { %v3296_v4 = vadd.f32 %v3295_v10, %v3294_v0  ;;  %v1781_v15 = vadd.f32 %v1780_v56, %v1620_v63  ;;  %v1633_v5 = vadd.f32 %v3293_v43, %v4693_v8  ;;  %v1832_v58 = vmax.f32 %v1778_v19, 0.0 }
 0x1ca   :  { %v1835_v2 = vmax.f32 %v1789_v61, 0.0 }
 0x1cb   :  { %v1833_v31 = vmax.f32 %v1781_v15, 0.0  ;;  %v1636_v16 = vadd.f32 %v3296_v4, %v4698_v44 }
 0x1cc   :  { %v1853_v28 = vpack.c.bf16 %v1835_v2, %v1834_v21 }
 0x1cd   :  { %v1852_v22 = vpack.c.bf16 %v1833_v31, %v1832_v58  ;;  %v3297_v24 = vpop.f32.mrb[108].mxu0  ;;  %v3400_v23 = vpop.f32.mrb[108].mxu1 }
 0x1ce   :  { %v3298_v3 = vpop.f32.mrb[109].mxu0  ;;  %v1793_v12 = vpop.f32.mrb[109].mxu1 }
 0x1cf   :  { %v3299_v60 = vadd.f32 %v3298_v3, %v3297_v24  ;;  %v1794_v34 = vadd.f32 %v1793_v12, %v1633_v5  ;;  %v3300_v35 = vpop.f32.mrb[110].mxu0  ;;  %v3401_v13 = vpop.f32.mrb[110].mxu1  ;;  %3442 = vmatprep.mubr.bf16.mxu1 %v1852_v22 }
 0x1d0   :  { %v3301_v49 = vpop.f32.mrb[111].mxu0  ;;  %v1796_v50 = vpop.f32.mrb[111].mxu1  ;;  %3443 = vmatmul.mubr.bf16.gmra.mrb[136].mxu1 %v1853_v28 }
 0x1d1   :  { %v1641_v8 = vadd.f32 %v3299_v60, %v4707_v17  ;;  %v3302_v30 = vadd.f32 %v3301_v49, %v3300_v35  ;;  %v1797_v45 = vadd.f32 %v1796_v50, %v1636_v16  ;;  %v1836_v44 = vmax.f32 %v1794_v34, 0.0 }
 0x1d3   :  { %v1802_v53 = vadd.f32 %v3400_v23, %v1641_v8  ;;  %v1644_v63 = vadd.f32 %v3302_v30, %v4712_v20  ;;  %v1837_v18 = vmax.f32 %v1797_v45, 0.0 }
 0x1d5   :  { %v1805_v11 = vadd.f32 %v3401_v13, %v1644_v63  ;;  %v1854_v59 = vpack.c.bf16 %v1837_v18, %v1836_v44  ;;  %v1838_v29 = vmax.f32 %v1802_v53, 0.0 }
 0x1d7   :  { %v1839_v25 = vmax.f32 %v1805_v11, 0.0  ;;  %3446 = vmatprep.mubr.bf16.mxu1 %v1854_v59 }
 0x1d9   :  { %v1855_v26 = vpack.c.bf16 %v1839_v25, %v1838_v29 }
 0x1db   :  { %3447 = vmatmul.mubr.bf16.gmra.mrb[140].mxu1 %v1855_v26 }
 0x273   :  { %v3420_v17 = vpop.f32.mrb[112].mxu1 }
 0x274   :  { %v1970_v7 = vadd.f32 %v3420_v17, %v4761_v27  ;;  %v1961_v33 = vpop.f32.mrb[113].mxu1 }
 0x275   :  { %v1962_v51 = vadd.f32 %v4761_v27, %v1961_v33  ;;  %v3421_v20 = vpop.f32.mrb[114].mxu1 }
 0x276   :  { %v1973_v40 = vadd.f32 %v3421_v20, %v4761_v27  ;;  %v1964_v6 = vpop.f32.mrb[115].mxu1  ;;  %v2090_v14 = vmax.f32 %v1970_v7, 0.0 }
 0x277   :  { %v1965_v57 = vadd.f32 %v4761_v27, %v1964_v6  ;;  %v2088_v54 = vmax.f32 %v1962_v51, 0.0 }
 0x278   :  { %v2091_v52 = vmax.f32 %v1973_v40, 0.0 }
 0x279   :  { %v2089_v37 = vmax.f32 %v1965_v57, 0.0 }
 0x27a   :  { %v2121_v38 = vpack.c.bf16 %v2091_v52, %v2090_v14 }
 0x27b   :  { %v2120_v9 = vpack.c.bf16 %v2089_v37, %v2088_v54  ;;  %v3424_v47 = vpop.f32.mrb[116].mxu1 }
 0x27c   :  { %v1986_v41 = vadd.f32 %v3424_v47, %v4761_v27  ;;  %v1977_v55 = vpop.f32.mrb[117].mxu1 }
 0x27d   :  { %v1978_v48 = vadd.f32 %v4761_v27, %v1977_v55  ;;  %v3425_v39 = vpop.f32.mrb[118].mxu1  ;;  %3466 = vmatprep.mubr.bf16.mxu0 %v2120_v9 }
 0x27e   :  { %v1989_v42 = vadd.f32 %v3425_v39, %v4761_v27  ;;  %v1980_v32 = vpop.f32.mrb[119].mxu1  ;;  %3467 = vmatmul.mubr.bf16.vlgmr.msra.gmra.mrb[112].mxu0 %v2121_v38  ;;  %v2094_v46 = vmax.f32 %v1986_v41, 0.0 }
 0x27f   :  { %v1981_v62 = vadd.f32 %v4761_v27, %v1980_v32  ;;  %v2092_v43 = vmax.f32 %v1978_v48, 0.0 }
 0x280   :  { %v2095_v1 = vmax.f32 %v1989_v42, 0.0 }
 0x281   :  { %v2093_v19 = vmax.f32 %v1981_v62, 0.0 }
 0x282   :  { %v2123_v0 = vpack.c.bf16 %v2095_v1, %v2094_v46 }
 0x283   :  { %v2122_v36 = vpack.c.bf16 %v2093_v19, %v2092_v43  ;;  %v3428_v61 = vpop.f32.mrb[120].mxu1 }
 0x284   :  { %v2002_v10 = vadd.f32 %v3428_v61, %v4761_v27  ;;  %v1993_v56 = vpop.f32.mrb[121].mxu1 }
 0x285   :  { %v1994_v4 = vadd.f32 %v4761_v27, %v1993_v56  ;;  %v3429_v15 = vpop.f32.mrb[122].mxu1  ;;  %3470 = vmatprep.mubr.bf16.mxu0 %v2122_v36 }
 0x286   :  { %v2005_v5 = vadd.f32 %v3429_v15, %v4761_v27  ;;  %v1996_v21 = vpop.f32.mrb[123].mxu1  ;;  %3471 = vmatmul.mubr.bf16.gmra.mrb[116].mxu0 %v2123_v0  ;;  %v2098_v58 = vmax.f32 %v2002_v10, 0.0 }
 0x287   :  { %v1997_v2 = vadd.f32 %v4761_v27, %v1996_v21  ;;  %v2096_v16 = vmax.f32 %v1994_v4, 0.0 }
 0x288   :  { %v2099_v31 = vmax.f32 %v2005_v5, 0.0 }
 0x289   :  { %v2097_v28 = vmax.f32 %v1997_v2, 0.0 }
 0x28a   :  { %v2125_v22 = vpack.c.bf16 %v2099_v31, %v2098_v58 }
 0x28b   :  { %v2124_v24 = vpack.c.bf16 %v2097_v28, %v2096_v16  ;;  %v3432_v23 = vpop.f32.mrb[124].mxu1 }
 0x28c   :  { %v2018_v3 = vadd.f32 %v3432_v23, %v4761_v27  ;;  %v2009_v12 = vpop.f32.mrb[125].mxu1 }
 0x28d   :  { %v2010_v60 = vadd.f32 %v4761_v27, %v2009_v12  ;;  %v3433_v34 = vpop.f32.mrb[126].mxu1  ;;  %3474 = vmatprep.mubr.bf16.mxu0 %v2124_v24 }
 0x28e   :  { %v2021_v35 = vadd.f32 %v3433_v34, %v4761_v27  ;;  %v2012_v13 = vpop.f32.mrb[127].mxu1  ;;  %3475 = vmatmul.mubr.bf16.gmra.mrb[120].mxu0 %v2125_v22  ;;  %v2102_v50 = vmax.f32 %v2018_v3, 0.0 }
 0x28f   :  { %v2013_v49 = vadd.f32 %v4761_v27, %v2012_v13  ;;  %v2100_v30 = vmax.f32 %v2010_v60, 0.0 }
 0x290   :  { %v2103_v8 = vmax.f32 %v2021_v35, 0.0 }
 0x291   :  { %v2101_v45 = vmax.f32 %v2013_v49, 0.0  ;;  %v2368_v49 = vlaneseq }
 0x292   :  { %v2127_v53 = vpack.c.bf16 %v2103_v8, %v2102_v50  ;;  %v4800_v8 = vld [vmem:[%s5173_s6] ss:$0 sm:$0xff]  ;;  %s3894_s6 = smov [#allocation2]  }
 0x293   :  { %v2126_v44 = vpack.c.bf16 %v2101_v45, %v2100_v30  ;;  %v3436_v63 = vpop.f32.mrb[128].mxu1  ;;  %v4795_v50 = vand.u32 127, %v2368_v49  ;;  %s2760_s25 = sshll.u32 %s3894_s6, 4  ;;  %s2761_s25 = int_to_ptr.vmem [resolvable:$true] %s2760_s25 }
 0x294   :  { %v2034_v18 = vadd.f32 %v3436_v63, %v4761_v27  ;;  %v2025_v11 = vpop.f32.mrb[129].mxu1  ;;  %s3870_s1 = scalar_lea.vmem %s2761_s25, 4096  ;;  %p3875_p1 = scmp.lt.s32.totalorder %s2761_s25, %s2761_s25 }
 0x295   :  { %v2026_v59 = vadd.f32 %v4761_v27, %v2025_v11  ;;  %v3437_v29 = vpop.f32.mrb[130].mxu1  ;;  %3478 = vmatprep.mubr.bf16.mxu0 %v2126_v44  ;;  %vm2370_vm1 = vcmp.lt.s32.totalorder %v4795_v50, 10  ;;  %p3871_p0 = scmp.ne.s32.totalorder %s2761_s25, %s3870_s1  ;;  %p3876_p2 = scmp.lt.s32.totalorder %s3870_s1, %s3870_s1 }
 0x296   :  { %v2037_v25 = vadd.f32 %v3437_v29, %v4761_v27  ;;  %v2028_v26 = vpop.f32.mrb[131].mxu1  ;;  %3479 = vmatmul.mubr.bf16.gmra.mrb[124].mxu0 %v2127_v53  ;;  %v2106_v7 = vmax.f32 %v2034_v18, 0.0 }
 0x297   :  { %v2029_v17 = vadd.f32 %v4761_v27, %v2028_v26  ;;  %v2104_v51 = vmax.f32 %v2026_v59, 0.0  ;;  %p3877_p3 = por %p3876_p2, %p3875_p1 }
 0x298   :  { %v2107_v33 = vmax.f32 %v2037_v25, 0.0 }
 0x299   :  { %v2105_v20 = vmax.f32 %v2029_v17, 0.0  ;;  %p3878_p4 = pnand %p3877_p3, %p3871_p0 }
 0x29a   :  { %v2129_v40 = vpack.c.bf16 %v2107_v33, %v2106_v7 }
 0x29b   :  { %v2128_v6 = vpack.c.bf16 %v2105_v20, %v2104_v51  ;;  %v3440_v57 = vpop.f32.mrb[132].mxu1 }
 0x29c   :  { %v2050_v14 = vadd.f32 %v3440_v57, %v4761_v27  ;;  %v2041_v52 = vpop.f32.mrb[133].mxu1 }
 0x29d   :  { %v2042_v54 = vadd.f32 %v4761_v27, %v2041_v52  ;;  %v3441_v37 = vpop.f32.mrb[134].mxu1  ;;  %3482 = vmatprep.mubr.bf16.mxu0 %v2128_v6 }
 0x29e   :  { %v2053_v38 = vadd.f32 %v3441_v37, %v4761_v27  ;;  %v2044_v9 = vpop.f32.mrb[135].mxu1  ;;  %3483 = vmatmul.mubr.bf16.gmra.mrb[128].mxu0 %v2129_v40  ;;  %v2110_v41 = vmax.f32 %v2050_v14, 0.0 }
 0x29f   :  { %v2045_v47 = vadd.f32 %v4761_v27, %v2044_v9  ;;  %v2108_v48 = vmax.f32 %v2042_v54, 0.0 }
 0x2a0   :  { %v2111_v55 = vmax.f32 %v2053_v38, 0.0 }
 0x2a1   :  { %v2109_v39 = vmax.f32 %v2045_v47, 0.0 }
 0x2a2   :  { %v2131_v42 = vpack.c.bf16 %v2111_v55, %v2110_v41 }
 0x2a3   :  { %v2130_v32 = vpack.c.bf16 %v2109_v39, %v2108_v48  ;;  %v3444_v62 = vpop.f32.mrb[136].mxu1 }
 0x2a4   :  { %v2066_v46 = vadd.f32 %v3444_v62, %v4761_v27  ;;  %v2057_v1 = vpop.f32.mrb[137].mxu1 }
 0x2a5   :  { %v2058_v43 = vadd.f32 %v4761_v27, %v2057_v1  ;;  %v3445_v19 = vpop.f32.mrb[138].mxu1  ;;  %3486 = vmatprep.mubr.bf16.mxu0 %v2130_v32 }
 0x2a6   :  { %v2069_v0 = vadd.f32 %v3445_v19, %v4761_v27  ;;  %v2060_v36 = vpop.f32.mrb[139].mxu1  ;;  %3487 = vmatmul.mubr.bf16.gmra.mrb[132].mxu0 %v2131_v42  ;;  %v2114_v10 = vmax.f32 %v2066_v46, 0.0 }
 0x2a7   :  { %v2061_v61 = vadd.f32 %v4761_v27, %v2060_v36  ;;  %v2112_v4 = vmax.f32 %v2058_v43, 0.0 }
 0x2a8   :  { %v2115_v56 = vmax.f32 %v2069_v0, 0.0 }
 0x2a9   :  { %v2113_v15 = vmax.f32 %v2061_v61, 0.0 }
 0x2aa   :  { %v2133_v5 = vpack.c.bf16 %v2115_v56, %v2114_v10 }
 0x2ab   :  { %v2132_v21 = vpack.c.bf16 %v2113_v15, %v2112_v4 }
 0x2ad   :  { %3490 = vmatprep.mubr.bf16.mxu0 %v2132_v21 }
 0x2ae   :  { %v3448_v2 = vpop.f32.mrb[140].mxu1  ;;  %3491 = vmatmul.mubr.bf16.gmra.mrb[136].mxu0 %v2133_v5 }
 0x2af   :  { %v2082_v58 = vadd.f32 %v3448_v2, %v4761_v27  ;;  %v2073_v31 = vpop.f32.mrb[141].mxu1 }
 0x2b0   :  { %v2074_v16 = vadd.f32 %v4761_v27, %v2073_v31  ;;  %v3449_v28 = vpop.f32.mrb[142].mxu1 }
 0x2b1   :  { %v2085_v22 = vadd.f32 %v3449_v28, %v4761_v27  ;;  %v2076_v24 = vpop.f32.mrb[143].mxu1  ;;  %v2118_v3 = vmax.f32 %v2082_v58, 0.0 }
 0x2b2   :  { %v2077_v23 = vadd.f32 %v4761_v27, %v2076_v24  ;;  %v2116_v60 = vmax.f32 %v2074_v16, 0.0 }
 0x2b3   :  { %v2119_v12 = vmax.f32 %v2085_v22, 0.0 }
 0x2b4   :  { %v2117_v34 = vmax.f32 %v2077_v23, 0.0 }
 0x2b5   :  { %v2135_v35 = vpack.c.bf16 %v2119_v12, %v2118_v3 }
 0x2b6   :  { %v2134_v13 = vpack.c.bf16 %v2117_v34, %v2116_v60 }
 0x2b8   :  { %3494 = vmatprep.mubr.bf16.mxu0 %v2134_v13 }
 0x2b9   :  { %3495 = vmatmul.mubr.bf16.gmra.mrb[140].mxu0 %v2135_v35 }
 0x351   :  { %v3468_v30 = vpop.f32.mrb[112].mxu0 }
 0x352   :  { %v2250_v27 = vadd.f32 %v3468_v30, %v4800_v8  ;;  %v2241_v45 = vpop.f32.mrb[113].mxu0 }
 0x353   :  { %v2242_v53 = vadd.f32 %v4800_v8, %v2241_v45  ;;  %v3469_v44 = vpop.f32.mrb[114].mxu0 }
 0x354   :  { %v2253_v63 = vadd.f32 %v3469_v44, %v4800_v8  ;;  %v2244_v18 = vpop.f32.mrb[115].mxu0  ;;  %v4808_v11 = vsel %vm2370_vm1, %v2250_v27, -1e+30 }
 0x355   :  { %v2245_v59 = vadd.f32 %v4800_v8, %v2244_v18  ;;  %2407 = vmax.xlane.f32.xlu1 %v4808_v11  ;;  %v4814_v29 = vsel %vm2370_vm1, %v2242_v53, -1e+30 }
 0x356   :  { %2403 = vmax.xlane.f32.xlu0 %v4814_v29  ;;  %v4819_v25 = vsel %vm2370_vm1, %v2253_v63, -1e+30 }
 0x357   :  { %v4824_v17 = vsel %vm2370_vm1, %v2245_v59, -1e+30 }
 0x359   :  { %2409 = vmax.xlane.f32.xlu1 %v4819_v25  ;;  %v3472_v26 = vpop.f32.mrb[116].mxu0 }
 0x35a   :  { %v2266_v7 = vadd.f32 %v3472_v26, %v4800_v8  ;;  %v2257_v33 = vpop.f32.mrb[117].mxu0  ;;  %2405 = vmax.xlane.f32.xlu0 %v4824_v17 }
 0x35b   :  { %v3473_v51 = vpop.f32.mrb[118].mxu0  ;;  %v2258_v57 = vadd.f32 %v4800_v8, %v2257_v33 }
 0x35c   :  { %v2269_v20 = vadd.f32 %v3473_v51, %v4800_v8  ;;  %v2260_v40 = vpop.f32.mrb[119].mxu0  ;;  %v4831_v6 = vsel %vm2370_vm1, %v2266_v7, -1e+30 }
 0x35d   :  { %v2261_v14 = vadd.f32 %v4800_v8, %v2260_v40  ;;  %v4843_v37 = vsel %vm2370_vm1, %v2258_v57, -1e+30 }
 0x35e   :  { %2415 = vmax.xlane.f32.xlu0 %v4831_v6  ;;  %v4838_v52 = vsel %vm2370_vm1, %v2269_v20, -1e+30 }
 0x35f   :  { %2417 = vmax.xlane.f32.xlu1 %v4838_v52  ;;  %v4849_v47 = vsel %vm2370_vm1, %v2261_v14, -1e+30 }
 0x361   :  { %v3476_v54 = vpop.f32.mrb[120].mxu0 }
 0x362   :  { %v2282_v38 = vadd.f32 %v3476_v54, %v4800_v8  ;;  %v2273_v9 = vpop.f32.mrb[121].mxu0  ;;  %2411 = vmax.xlane.f32.xlu0 %v4843_v37 }
 0x363   :  { %v3477_v41 = vpop.f32.mrb[122].mxu0  ;;  %2413 = vmax.xlane.f32.xlu1 %v4849_v47  ;;  %v2274_v42 = vadd.f32 %v4800_v8, %v2273_v9 }
 0x364   :  { %v2285_v55 = vadd.f32 %v3477_v41, %v4800_v8  ;;  %v2276_v48 = vpop.f32.mrb[123].mxu0  ;;  %v4855_v39 = vsel %vm2370_vm1, %v2282_v38, -1e+30 }
 0x365   :  { %v2277_v32 = vadd.f32 %v4800_v8, %v2276_v48  ;;  %v4867_v1 = vsel %vm2370_vm1, %v2274_v42, -1e+30 }
 0x366   :  { %2423 = vmax.xlane.f32.xlu0 %v4855_v39  ;;  %v4862_v62 = vsel %vm2370_vm1, %v2285_v55, -1e+30 }
 0x367   :  { %2425 = vmax.xlane.f32.xlu1 %v4862_v62  ;;  %v4873_v0 = vsel %vm2370_vm1, %v2277_v32, -1e+30 }
 0x369   :  { %v3480_v46 = vpop.f32.mrb[124].mxu0 }
 0x36a   :  { %v2298_v43 = vadd.f32 %v3480_v46, %v4800_v8  ;;  %v2289_v19 = vpop.f32.mrb[125].mxu0  ;;  %2419 = vmax.xlane.f32.xlu0 %v4867_v1 }
 0x36b   :  { %v3481_v36 = vpop.f32.mrb[126].mxu0  ;;  %2421 = vmax.xlane.f32.xlu1 %v4873_v0  ;;  %v2290_v4 = vadd.f32 %v4800_v8, %v2289_v19 }
 0x36c   :  { %v2301_v61 = vadd.f32 %v3481_v36, %v4800_v8  ;;  %v2292_v10 = vpop.f32.mrb[127].mxu0  ;;  %v4879_v56 = vsel %vm2370_vm1, %v2298_v43, -1e+30 }
 0x36d   :  { %v2293_v15 = vadd.f32 %v4800_v8, %v2292_v10  ;;  %v4891_v2 = vsel %vm2370_vm1, %v2290_v4, -1e+30 }
 0x36e   :  { %2431 = vmax.xlane.f32.xlu0 %v4879_v56  ;;  %v4886_v5 = vsel %vm2370_vm1, %v2301_v61, -1e+30 }
 0x36f   :  { %2433 = vmax.xlane.f32.xlu1 %v4886_v5  ;;  %v4897_v16 = vsel %vm2370_vm1, %v2293_v15, -1e+30 }
 0x371   :  { %v3484_v21 = vpop.f32.mrb[128].mxu0 }
 0x372   :  { %v2314_v58 = vadd.f32 %v3484_v21, %v4800_v8  ;;  %v2305_v31 = vpop.f32.mrb[129].mxu0  ;;  %2427 = vmax.xlane.f32.xlu0 %v4891_v2 }
 0x373   :  { %v3485_v28 = vpop.f32.mrb[130].mxu0  ;;  %2429 = vmax.xlane.f32.xlu1 %v4897_v16  ;;  %v2306_v3 = vadd.f32 %v4800_v8, %v2305_v31 }
 0x374   :  { %v2317_v22 = vadd.f32 %v3485_v28, %v4800_v8  ;;  %v2308_v24 = vpop.f32.mrb[131].mxu0  ;;  %v4903_v23 = vsel %vm2370_vm1, %v2314_v58, -1e+30 }
 0x375   :  { %v2309_v12 = vadd.f32 %v4800_v8, %v2308_v24  ;;  %v4915_v35 = vsel %vm2370_vm1, %v2306_v3, -1e+30 }
 0x376   :  { %2439 = vmax.xlane.f32.xlu0 %v4903_v23  ;;  %v4910_v60 = vsel %vm2370_vm1, %v2317_v22, -1e+30 }
 0x377   :  { %2441 = vmax.xlane.f32.xlu1 %v4910_v60  ;;  %v4921_v30 = vsel %vm2370_vm1, %v2309_v12, -1e+30 }
 0x379   :  { %v3488_v34 = vpop.f32.mrb[132].mxu0 }
 0x37a   :  { %v2330_v13 = vadd.f32 %v3488_v34, %v4800_v8  ;;  %v2321_v49 = vpop.f32.mrb[133].mxu0  ;;  %2435 = vmax.xlane.f32.xlu0 %v4915_v35 }
 0x37b   :  { %v3489_v27 = vpop.f32.mrb[134].mxu0  ;;  %2437 = vmax.xlane.f32.xlu1 %v4921_v30  ;;  %v2322_v63 = vadd.f32 %v4800_v8, %v2321_v49 }
 0x37c   :  { %v2333_v45 = vadd.f32 %v3489_v27, %v4800_v8  ;;  %v2324_v53 = vpop.f32.mrb[135].mxu0  ;;  %v4927_v44 = vsel %vm2370_vm1, %v2330_v13, -1e+30 }
 0x37d   :  { %v2325_v18 = vadd.f32 %v4800_v8, %v2324_v53  ;;  %v4939_v7 = vsel %vm2370_vm1, %v2322_v63, -1e+30 }
 0x37e   :  { %2447 = vmax.xlane.f32.xlu0 %v4927_v44  ;;  %v4934_v59 = vsel %vm2370_vm1, %v2333_v45, -1e+30 }
 0x37f   :  { %2449 = vmax.xlane.f32.xlu1 %v4934_v59  ;;  %v4945_v20 = vsel %vm2370_vm1, %v2325_v18, -1e+30 }
 0x381   :  { %v3492_v26 = vpop.f32.mrb[136].mxu0 }
 0x382   :  { %v2346_v33 = vadd.f32 %v3492_v26, %v4800_v8  ;;  %v2337_v51 = vpop.f32.mrb[137].mxu0  ;;  %2443 = vmax.xlane.f32.xlu0 %v4939_v7 }
 0x383   :  { %v3493_v40 = vpop.f32.mrb[138].mxu0  ;;  %2445 = vmax.xlane.f32.xlu1 %v4945_v20  ;;  %v2338_v38 = vadd.f32 %v4800_v8, %v2337_v51 }
 0x384   :  { %v2349_v57 = vadd.f32 %v3493_v40, %v4800_v8  ;;  %v2340_v14 = vpop.f32.mrb[139].mxu0  ;;  %v4951_v54 = vsel %vm2370_vm1, %v2346_v33, -1e+30 }
 0x385   :  { %v2341_v9 = vadd.f32 %v4800_v8, %v2340_v14  ;;  %v4963_v55 = vsel %vm2370_vm1, %v2338_v38, -1e+30 }
 0x386   :  { %2455 = vmax.xlane.f32.xlu0 %v4951_v54  ;;  %v4958_v41 = vsel %vm2370_vm1, %v2349_v57, -1e+30 }
 0x387   :  { %2457 = vmax.xlane.f32.xlu1 %v4958_v41  ;;  %v4968_v48 = vsel %vm2370_vm1, %v2341_v9, -1e+30 }
 0x38a   :  { %2451 = vmax.xlane.f32.xlu0 %v4963_v55 }
 0x38b   :  { %2453 = vmax.xlane.f32.xlu1 %v4968_v48 }
 0x38c   :  { %v3496_v42 = vpop.f32.mrb[140].mxu0 }
 0x38d   :  { %v2362_v32 = vadd.f32 %v3496_v42, %v4800_v8  ;;  %v2353_v46 = vpop.f32.mrb[141].mxu0 }
 0x38e   :  { %v2354_v43 = vadd.f32 %v4800_v8, %v2353_v46  ;;  %v3497_v19 = vpop.f32.mrb[142].mxu0 }
 0x38f   :  { %v2365_v36 = vadd.f32 %v3497_v19, %v4800_v8  ;;  %v2356_v61 = vpop.f32.mrb[143].mxu0  ;;  %v4976_v10 = vsel %vm2370_vm1, %v2362_v32, -1e+30 }
 0x390   :  { %v2357_v4 = vadd.f32 %v4800_v8, %v2356_v61  ;;  %v4981_v15 = vsel %vm2370_vm1, %v2354_v43, -1e+30 }
 0x391   :  { %2459 = vmax.xlane.f32.xlu0 %v4981_v15  ;;  %v4986_v21 = vsel %vm2370_vm1, %v2365_v36, -1e+30 }
 0x392   :  { %v4990_v58 = vsel %vm2370_vm1, %v2357_v4, -1e+30 }
 0x393   :  { %2461 = vmax.xlane.f32.xlu1 %v4990_v58 }
 0x395   :  { %2463 = vmax.xlane.f32.xlu0 %v4976_v10 }
 0x397   :  { %2465 = vmax.xlane.f32.xlu1 %v4986_v21 }
 0x3e2   :  { %v2408_v8 = vpop.xlane.xlu1 %2407 }
 0x3e3   :  { %v4996_v31 = vsub.f32 %v4808_v11, %v2408_v8  ;;  %v2404_v28 = vpop.xlane.xlu0 %2403 }
 0x3e4   :  { %v4999_v22 = vsub.f32 %v4814_v29, %v2404_v28 }
 0x3e5   :  { %v2503_v24 = vmul.f32 1.442695, %v4996_v31 }
 0x3e6   :  { %v2499_v50 = vmul.f32 1.442695, %v4999_v22  ;;  %v2410_v3 = vpop.xlane.xlu1 %2409 }
 0x3e7   :  { %3742 = vpow2.f32 %v2503_v24  ;;  %v5004_v12 = vsub.f32 %v4819_v25, %v2410_v3  ;;  %v2406_v34 = vpop.xlane.xlu0 %2405 }
 0x3e8   :  { %v5007_v13 = vsub.f32 %v4824_v17, %v2406_v34  ;;  %3744 = vpow2.f32 %v2499_v50 }
 0x3e9   :  { %v2505_v11 = vmul.f32 1.442695, %v5004_v12 }
 0x3ea   :  { %v2501_v29 = vmul.f32 1.442695, %v5007_v13 }
 0x3eb   :  { %3746 = vpow2.f32 %v2505_v11  ;;  %v2416_v49 = vpop.xlane.xlu0 %2415 }
 0x3ec   :  { %v5012_v27 = vsub.f32 %v4831_v6, %v2416_v49  ;;  %v2418_v45 = vpop.xlane.xlu1 %2417  ;;  %3748 = vpow2.f32 %v2501_v29 }
 0x3ed   :  { %v5015_v53 = vsub.f32 %v4838_v52, %v2418_v45 }
 0x3ee   :  { %v2511_v25 = vmul.f32 1.442695, %v5012_v27 }
 0x3ef   :  { %v2513_v17 = vmul.f32 1.442695, %v5015_v53  ;;  %v2412_v63 = vpop.xlane.xlu0 %2411 }
 0x3f0   :  { %3750 = vpow2.f32 %v2511_v25  ;;  %v5020_v18 = vsub.f32 %v4843_v37, %v2412_v63  ;;  %v2414_v26 = vpop.xlane.xlu1 %2413 }
 0x3f1   :  { %v3743_v33 = vpop.eup %3742  ;;  %v5023_v51 = vsub.f32 %v4849_v47, %v2414_v26  ;;  %3752 = vpow2.f32 %v2513_v17 }
 0x3f2   :  { %v2507_v6 = vmul.f32 1.442695, %v5020_v18  ;;  %2567 = vadd.xlane.f32.xlu0 %v3743_v33  ;;  %v3745_v57 = vpop.eup %3744 }
 0x3f3   :  { %v2509_v52 = vmul.f32 1.442695, %v5023_v51  ;;  %v2424_v40 = vpop.xlane.xlu0 %2423 }
 0x3f4   :  { %3754 = vpow2.f32 %v2507_v6  ;;  %v5028_v14 = vsub.f32 %v4855_v39, %v2424_v40  ;;  %v2426_v38 = vpop.xlane.xlu1 %2425 }
 0x3f5   :  { %v3747_v37 = vpop.eup %3746  ;;  %v5031_v9 = vsub.f32 %v4862_v62, %v2426_v38  ;;  %3756 = vpow2.f32 %v2509_v52 }
 0x3f6   :  { %v2519_v47 = vmul.f32 1.442695, %v5028_v14  ;;  %2569 = vadd.xlane.f32.xlu1 %v3747_v37  ;;  %2563 = vadd.xlane.f32.xlu0 %v3745_v57  ;;  %v3749_v39 = vpop.eup %3748 }
 0x3f7   :  { %v2521_v42 = vmul.f32 1.442695, %v5031_v9  ;;  %v2420_v32 = vpop.xlane.xlu0 %2419 }
 0x3f8   :  { %3758 = vpow2.f32 %v2519_v47  ;;  %v5036_v46 = vsub.f32 %v4867_v1, %v2420_v32  ;;  %v2422_v43 = vpop.xlane.xlu1 %2421 }
 0x3f9   :  { %v5039_v19 = vsub.f32 %v4873_v0, %v2422_v43  ;;  %3760 = vpow2.f32 %v2521_v42 }
 0x3fa   :  { %v3751_v36 = vpop.eup %3750  ;;  %v2515_v62 = vmul.f32 1.442695, %v5036_v46  ;;  %2565 = vadd.xlane.f32.xlu1 %v3749_v39 }
 0x3fb   :  { %v2517_v61 = vmul.f32 1.442695, %v5039_v19  ;;  %2575 = vadd.xlane.f32.xlu0 %v3751_v36  ;;  %v2432_v4 = vpop.xlane.xlu0 %2431  ;;  %v3753_v28 = vpop.eup %3752 }
 0x3fc   :  { %3762 = vpow2.f32 %v2515_v62  ;;  %v5044_v8 = vsub.f32 %v4879_v56, %v2432_v4  ;;  %v2434_v1 = vpop.xlane.xlu1 %2433 }
 0x3fd   :  { %v5047_v24 = vsub.f32 %v4886_v5, %v2434_v1  ;;  %3764 = vpow2.f32 %v2517_v61 }
 0x3fe   :  { %v3755_v0 = vpop.eup %3754  ;;  %v2527_v50 = vmul.f32 1.442695, %v5044_v8  ;;  %2577 = vadd.xlane.f32.xlu1 %v3753_v28 }
 0x3ff   :  { %v2529_v3 = vmul.f32 1.442695, %v5047_v24  ;;  %2571 = vadd.xlane.f32.xlu0 %v3755_v0  ;;  %v2428_v34 = vpop.xlane.xlu0 %2427  ;;  %v3757_v29 = vpop.eup %3756 }
 0x400   :  { %3766 = vpow2.f32 %v2527_v50  ;;  %v5052_v11 = vsub.f32 %v4891_v2, %v2428_v34  ;;  %v2430_v56 = vpop.xlane.xlu1 %2429 }
 0x401   :  { %v5055_v49 = vsub.f32 %v4897_v16, %v2430_v56  ;;  %3768 = vpow2.f32 %v2529_v3 }
 0x402   :  { %v3759_v5 = vpop.eup %3758  ;;  %v2523_v45 = vmul.f32 1.442695, %v5052_v11  ;;  %2573 = vadd.xlane.f32.xlu1 %v3757_v29 }
 0x403   :  { %v2525_v25 = vmul.f32 1.442695, %v5055_v49  ;;  %2583 = vadd.xlane.f32.xlu0 %v3759_v5  ;;  %v2440_v17 = vpop.xlane.xlu0 %2439  ;;  %v3761_v26 = vpop.eup %3760 }
 0x404   :  { %3770 = vpow2.f32 %v2523_v45  ;;  %v5060_v63 = vsub.f32 %v4903_v23, %v2440_v17  ;;  %v2442_v2 = vpop.xlane.xlu1 %2441 }
 0x405   :  { %v5063_v33 = vsub.f32 %v4910_v60, %v2442_v2  ;;  %3772 = vpow2.f32 %v2525_v25 }
 0x406   :  { %v3763_v16 = vpop.eup %3762  ;;  %v2535_v6 = vmul.f32 1.442695, %v5060_v63  ;;  %2585 = vadd.xlane.f32.xlu1 %v3761_v26 }
 0x407   :  { %v2537_v52 = vmul.f32 1.442695, %v5063_v33  ;;  %2579 = vadd.xlane.f32.xlu0 %v3763_v16  ;;  %v2436_v40 = vpop.xlane.xlu0 %2435  ;;  %v3765_v38 = vpop.eup %3764 }
 0x408   :  { %3774 = vpow2.f32 %v2535_v6  ;;  %v5068_v57 = vsub.f32 %v4915_v35, %v2436_v40  ;;  %v2438_v23 = vpop.xlane.xlu1 %2437 }
 0x409   :  { %v5071_v37 = vsub.f32 %v4921_v30, %v2438_v23  ;;  %3776 = vpow2.f32 %v2537_v52 }
 0x40a   :  { %v3767_v60 = vpop.eup %3766  ;;  %v2531_v47 = vmul.f32 1.442695, %v5068_v57  ;;  %2581 = vadd.xlane.f32.xlu1 %v3765_v38 }
 0x40b   :  { %v2533_v42 = vmul.f32 1.442695, %v5071_v37  ;;  %2591 = vadd.xlane.f32.xlu0 %v3767_v60  ;;  %v2448_v32 = vpop.xlane.xlu0 %2447  ;;  %v3769_v39 = vpop.eup %3768 }
 0x40c   :  { %3778 = vpow2.f32 %v2531_v47  ;;  %v5076_v43 = vsub.f32 %v4927_v44, %v2448_v32  ;;  %v2450_v35 = vpop.xlane.xlu1 %2449 }
 0x40d   :  { %v5079_v36 = vsub.f32 %v4934_v59, %v2450_v35  ;;  %3780 = vpow2.f32 %v2533_v42 }
 0x40e   :  { %v3771_v30 = vpop.eup %3770  ;;  %v2543_v62 = vmul.f32 1.442695, %v5076_v43  ;;  %2593 = vadd.xlane.f32.xlu1 %v3769_v39 }
 0x40f   :  { %v2545_v61 = vmul.f32 1.442695, %v5079_v36  ;;  %2587 = vadd.xlane.f32.xlu0 %v3771_v30  ;;  %v2444_v4 = vpop.xlane.xlu0 %2443  ;;  %v3773_v28 = vpop.eup %3772 }
 0x410   :  { %3782 = vpow2.f32 %v2543_v62  ;;  %v5084_v1 = vsub.f32 %v4939_v7, %v2444_v4  ;;  %v2446_v44 = vpop.xlane.xlu1 %2445 }
 0x411   :  { %v5087_v0 = vsub.f32 %v4945_v20, %v2446_v44  ;;  %3784 = vpow2.f32 %v2545_v61 }
 0x412   :  { %v3775_v59 = vpop.eup %3774  ;;  %v2539_v50 = vmul.f32 1.442695, %v5084_v1  ;;  %2589 = vadd.xlane.f32.xlu1 %v3773_v28 }
 0x413   :  { %v2541_v3 = vmul.f32 1.442695, %v5087_v0  ;;  %2599 = vadd.xlane.f32.xlu0 %v3775_v59  ;;  %v2456_v34 = vpop.xlane.xlu0 %2455  ;;  %v3777_v29 = vpop.eup %3776 }
 0x414   :  { %3786 = vpow2.f32 %v2539_v50  ;;  %v5092_v56 = vsub.f32 %v4951_v54, %v2456_v34  ;;  %v2458_v7 = vpop.xlane.xlu1 %2457 }
 0x415   :  { %v5095_v5 = vsub.f32 %v4958_v41, %v2458_v7  ;;  %3788 = vpow2.f32 %v2541_v3 }
 0x416   :  { %v3779_v20 = vpop.eup %3778  ;;  %v2551_v45 = vmul.f32 1.442695, %v5092_v56  ;;  %2601 = vadd.xlane.f32.xlu1 %v3777_v29 }
 0x417   :  { %v2553_v25 = vmul.f32 1.442695, %v5095_v5  ;;  %2595 = vadd.xlane.f32.xlu0 %v3779_v20  ;;  %v2452_v17 = vpop.xlane.xlu0 %2451  ;;  %v3781_v26 = vpop.eup %3780 }
 0x418   :  { %3790 = vpow2.f32 %v2551_v45  ;;  %v5100_v2 = vsub.f32 %v4963_v55, %v2452_v17  ;;  %v2454_v54 = vpop.xlane.xlu1 %2453 }
 0x419   :  { %v5103_v16 = vsub.f32 %v4968_v48, %v2454_v54  ;;  %3792 = vpow2.f32 %v2553_v25 }
 0x41a   :  { %v3783_v41 = vpop.eup %3782  ;;  %v2547_v6 = vmul.f32 1.442695, %v5100_v2  ;;  %2597 = vadd.xlane.f32.xlu1 %v3781_v26 }
 0x41b   :  { %v2549_v52 = vmul.f32 1.442695, %v5103_v16  ;;  %2607 = vadd.xlane.f32.xlu0 %v3783_v41  ;;  %v3785_v40 = vpop.eup %3784 }
 0x41c   :  { %3794 = vpow2.f32 %v2547_v6 }
 0x41d   :  { %3796 = vpow2.f32 %v2549_v52 }
 0x41e   :  { %v3787_v23 = vpop.eup %3786  ;;  %2609 = vadd.xlane.f32.xlu1 %v3785_v40  ;;  %v2460_v38 = vpop.xlane.xlu0 %2459 }
 0x41f   :  { %v5108_v55 = vsub.f32 %v4981_v15, %v2460_v38  ;;  %2603 = vadd.xlane.f32.xlu0 %v3787_v23  ;;  %v3789_v60 = vpop.eup %3788 }
 0x420   :  { %v2462_v48 = vpop.xlane.xlu1 %2461 }
 0x421   :  { %v2555_v47 = vmul.f32 1.442695, %v5108_v55  ;;  %v5112_v42 = vsub.f32 %v4990_v58, %v2462_v48 }
 0x422   :  { %v3791_v32 = vpop.eup %3790  ;;  %2605 = vadd.xlane.f32.xlu1 %v3789_v60  ;;  %v2464_v35 = vpop.xlane.xlu0 %2463 }
 0x423   :  { %3798 = vpow2.f32 %v2555_v47  ;;  %v2557_v39 = vmul.f32 1.442695, %v5112_v42  ;;  %v5116_v30 = vsub.f32 %v4976_v10, %v2464_v35  ;;  %2615 = vadd.xlane.f32.xlu0 %v3791_v32  ;;  %v3793_v62 = vpop.eup %3792 }
 0x424   :  { %v2466_v15 = vpop.xlane.xlu1 %2465 }
 0x425   :  { %3800 = vpow2.f32 %v2557_v39  ;;  %v2559_v61 = vmul.f32 1.442695, %v5116_v30  ;;  %v5120_v4 = vsub.f32 %v4986_v21, %v2466_v15 }
 0x426   :  { %v3795_v58 = vpop.eup %3794  ;;  %2617 = vadd.xlane.f32.xlu1 %v3793_v62 }
 0x427   :  { %3802 = vpow2.f32 %v2559_v61  ;;  %v2561_v44 = vmul.f32 1.442695, %v5120_v4  ;;  %2611 = vadd.xlane.f32.xlu0 %v3795_v58  ;;  %v3797_v28 = vpop.eup %3796 }
 0x429   :  { %3804 = vpow2.f32 %v2561_v44 }
 0x42a   :  { %2613 = vadd.xlane.f32.xlu1 %v3797_v28 }
 0x42d   :  { %v3799_v10 = vpop.eup %3798 }
 0x42e   :  { %2619 = vadd.xlane.f32.xlu0 %v3799_v10 }
 0x42f   :  { %v3801_v59 = vpop.eup %3800 }
 0x430   :  { %2621 = vadd.xlane.f32.xlu1 %v3801_v59 }
 0x431   :  { %v3803_v50 = vpop.eup %3802 }
 0x432   :  { %2623 = vadd.xlane.f32.xlu0 %v3803_v50 }
 0x433   :  { %v3805_v3 = vpop.eup %3804 }
 0x434   :  { %2625 = vadd.xlane.f32.xlu1 %v3805_v3 }
 0x47f   :  { %v2568_v34 = vpop.xlane.xlu0 %2567 }
 0x480   :  { %3806 = vlog2.f32 %v2568_v34 }
 0x483   :  { %v2570_v21 = vpop.xlane.xlu1 %2569  ;;  %v2564_v7 = vpop.xlane.xlu0 %2563 }
 0x484   :  { %3808 = vlog2.f32 %v2570_v21 }
 0x485   :  { %3810 = vlog2.f32 %v2564_v7 }
 0x487   :  { %v2566_v29 = vpop.xlane.xlu1 %2565 }
 0x488   :  { %3812 = vlog2.f32 %v2566_v29  ;;  %v2576_v20 = vpop.xlane.xlu0 %2575 }
 0x489   :  { %3814 = vlog2.f32 %v2576_v20 }
 0x48a   :  { %v3807_v45 = vpop.eup %3806 }
 0x48b   :  { %v2632_v25 = vmul.f32 0.6931472, %v3807_v45  ;;  %v2578_v17 = vpop.xlane.xlu1 %2577 }
 0x48c   :  { %3816 = vlog2.f32 %v2578_v17  ;;  %v2572_v54 = vpop.xlane.xlu0 %2571 }
 0x48d   :  { %v2693_v26 = vsub.f32 %v4996_v31, %v2632_v25  ;;  %3818 = vlog2.f32 %v2572_v54 }
 0x48e   :  { %v3809_v41 = vpop.eup %3808 }
 0x48f   :  { %v3811_v6 = vpop.eup %3810  ;;  %2725 = vst [vmem:[#allocation2 + $0x10] sm:$0xff] %v2693_v26  ;;  %v2634_v52 = vmul.f32 0.6931472, %v3809_v41  ;;  %v2574_v40 = vpop.xlane.xlu1 %2573 }
 0x490   :  { %v2628_v23 = vmul.f32 0.6931472, %v3811_v6  ;;  %3820 = vlog2.f32 %v2574_v40  ;;  %v2584_v38 = vpop.xlane.xlu0 %2583 }
 0x491   :  { %v2694_v48 = vsub.f32 %v5004_v12, %v2634_v52  ;;  %3822 = vlog2.f32 %v2584_v38 }
 0x492   :  { %v3813_v60 = vpop.eup %3812  ;;  %v2691_v47 = vsub.f32 %v4999_v22, %v2628_v23 }
 0x493   :  { %v3815_v32 = vpop.eup %3814  ;;  %2726 = vst [vmem:[#allocation2 + $0x18] sm:$0xff] %v2694_v48  ;;  %v2630_v35 = vmul.f32 0.6931472, %v3813_v60  ;;  %v2586_v39 = vpop.xlane.xlu1 %2585 }
 0x494   :  { %2723 = vst [vmem:[#allocation2] sm:$0xff] %v2691_v47  ;;  %v2640_v31 = vmul.f32 0.6931472, %v3815_v32  ;;  %3824 = vlog2.f32 %v2586_v39  ;;  %v2580_v15 = vpop.xlane.xlu0 %2579 }
 0x495   :  { %v2692_v62 = vsub.f32 %v5007_v13, %v2630_v35  ;;  %3826 = vlog2.f32 %v2580_v15 }
 0x496   :  { %v3817_v61 = vpop.eup %3816  ;;  %v2697_v58 = vsub.f32 %v5012_v27, %v2640_v31 }
 0x497   :  { %v3819_v44 = vpop.eup %3818  ;;  %2724 = vst [vmem:[#allocation2 + $0x8] sm:$0xff] %v2692_v62  ;;  %v2642_v12 = vmul.f32 0.6931472, %v3817_v61  ;;  %v2582_v28 = vpop.xlane.xlu1 %2581 }
 0x498   :  { %2729 = vst [vmem:[#allocation2 + $0x30] sm:$0xff] %v2697_v58  ;;  %v2636_v22 = vmul.f32 0.6931472, %v3819_v44  ;;  %3828 = vlog2.f32 %v2582_v28  ;;  %v2592_v10 = vpop.xlane.xlu0 %2591 }
 0x499   :  { %v2698_v59 = vsub.f32 %v5015_v53, %v2642_v12  ;;  %3830 = vlog2.f32 %v2592_v10 }
 0x49a   :  { %v3821_v50 = vpop.eup %3820  ;;  %v2695_v3 = vsub.f32 %v5020_v18, %v2636_v22 }
 0x49b   :  { %v3823_v34 = vpop.eup %3822  ;;  %2730 = vst [vmem:[#allocation2 + $0x38] sm:$0xff] %v2698_v59  ;;  %v2638_v13 = vmul.f32 0.6931472, %v3821_v50  ;;  %v2594_v21 = vpop.xlane.xlu1 %2593 }
 0x49c   :  { %2727 = vst [vmem:[#allocation2 + $0x20] sm:$0xff] %v2695_v3  ;;  %v2648_v27 = vmul.f32 0.6931472, %v3823_v34  ;;  %3832 = vlog2.f32 %v2594_v21  ;;  %v2588_v7 = vpop.xlane.xlu0 %2587 }
 0x49d   :  { %v2696_v29 = vsub.f32 %v5023_v51, %v2638_v13  ;;  %3834 = vlog2.f32 %v2588_v7 }
 0x49e   :  { %v3825_v20 = vpop.eup %3824  ;;  %v2701_v45 = vsub.f32 %v5028_v14, %v2648_v27 }
 0x49f   :  { %v3827_v25 = vpop.eup %3826  ;;  %2728 = vst [vmem:[#allocation2 + $0x28] sm:$0xff] %v2696_v29  ;;  %v2650_v53 = vmul.f32 0.6931472, %v3825_v20  ;;  %v2590_v17 = vpop.xlane.xlu1 %2589 }
 0x4a0   :  { %2733 = vst [vmem:[#allocation2 + $0x50] sm:$0xff] %v2701_v45  ;;  %v2644_v18 = vmul.f32 0.6931472, %v3827_v25  ;;  %3836 = vlog2.f32 %v2590_v17  ;;  %v2600_v54 = vpop.xlane.xlu0 %2599 }
 0x4a1   :  { %v2702_v26 = vsub.f32 %v5031_v9, %v2650_v53  ;;  %3838 = vlog2.f32 %v2600_v54 }
 0x4a2   :  { %v3829_v41 = vpop.eup %3828  ;;  %v2699_v6 = vsub.f32 %v5036_v46, %v2644_v18 }
 0x4a3   :  { %v3831_v52 = vpop.eup %3830  ;;  %2734 = vst [vmem:[#allocation2 + $0x58] sm:$0xff] %v2702_v26  ;;  %v2646_v51 = vmul.f32 0.6931472, %v3829_v41  ;;  %v2602_v40 = vpop.xlane.xlu1 %2601 }
 0x4a4   :  { %2731 = vst [vmem:[#allocation2 + $0x40] sm:$0xff] %v2699_v6  ;;  %v2656_v14 = vmul.f32 0.6931472, %v3831_v52  ;;  %3840 = vlog2.f32 %v2602_v40  ;;  %v2596_v23 = vpop.xlane.xlu0 %2595 }
 0x4a5   :  { %v2700_v38 = vsub.f32 %v5039_v19, %v2646_v51  ;;  %3842 = vlog2.f32 %v2596_v23 }
 0x4a6   :  { %v3833_v48 = vpop.eup %3832  ;;  %v2705_v60 = vsub.f32 %v5044_v8, %v2656_v14 }
 0x4a7   :  { %v3835_v47 = vpop.eup %3834  ;;  %2732 = vst [vmem:[#allocation2 + $0x48] sm:$0xff] %v2700_v38  ;;  %v2658_v9 = vmul.f32 0.6931472, %v3833_v48  ;;  %v2598_v32 = vpop.xlane.xlu1 %2597 }
 0x4a8   :  { %2737 = vst [vmem:[#allocation2 + $0x70] sm:$0xff] %v2705_v60  ;;  %v2652_v46 = vmul.f32 0.6931472, %v3835_v47  ;;  %3844 = vlog2.f32 %v2598_v32  ;;  %v2608_v35 = vpop.xlane.xlu0 %2607 }
 0x4a9   :  { %v2706_v39 = vsub.f32 %v5047_v24, %v2658_v9  ;;  %3846 = vlog2.f32 %v2608_v35 }
 0x4aa   :  { %v3837_v31 = vpop.eup %3836  ;;  %v2703_v15 = vsub.f32 %v5052_v11, %v2652_v46 }
 0x4ab   :  { %v3839_v62 = vpop.eup %3838  ;;  %2738 = vst [vmem:[#allocation2 + $0x78] sm:$0xff] %v2706_v39  ;;  %v2654_v19 = vmul.f32 0.6931472, %v3837_v31  ;;  %v2610_v61 = vpop.xlane.xlu1 %2609 }
 0x4ac   :  { %2735 = vst [vmem:[#allocation2 + $0x60] sm:$0xff] %v2703_v15  ;;  %v2664_v8 = vmul.f32 0.6931472, %v3839_v62  ;;  %3848 = vlog2.f32 %v2610_v61  ;;  %v2604_v58 = vpop.xlane.xlu0 %2603 }
 0x4ad   :  { %v2704_v44 = vsub.f32 %v5055_v49, %v2654_v19  ;;  %3850 = vlog2.f32 %v2604_v58 }
 0x4ae   :  { %v3841_v12 = vpop.eup %3840  ;;  %v2709_v28 = vsub.f32 %v5060_v63, %v2664_v8 }
 0x4af   :  { %v3843_v22 = vpop.eup %3842  ;;  %2736 = vst [vmem:[#allocation2 + $0x68] sm:$0xff] %v2704_v44  ;;  %v2666_v24 = vmul.f32 0.6931472, %v3841_v12  ;;  %v2606_v10 = vpop.xlane.xlu1 %2605 }
 0x4b0   :  { %2741 = vst [vmem:[#allocation2 + $0x90] sm:$0xff] %v2709_v28  ;;  %v2660_v11 = vmul.f32 0.6931472, %v3843_v22  ;;  %3852 = vlog2.f32 %v2606_v10  ;;  %v2616_v59 = vpop.xlane.xlu0 %2615 }
 0x4b1   :  { %v2710_v50 = vsub.f32 %v5063_v33, %v2666_v24  ;;  %3854 = vlog2.f32 %v2616_v59 }
 0x4b2   :  { %v3845_v3 = vpop.eup %3844  ;;  %v2707_v34 = vsub.f32 %v5068_v57, %v2660_v11 }
 0x4b3   :  { %v3847_v13 = vpop.eup %3846  ;;  %2742 = vst [vmem:[#allocation2 + $0x98] sm:$0xff] %v2710_v50  ;;  %v2662_v49 = vmul.f32 0.6931472, %v3845_v3  ;;  %v2618_v21 = vpop.xlane.xlu1 %2617 }
 0x4b4   :  { %2739 = vst [vmem:[#allocation2 + $0x80] sm:$0xff] %v2707_v34  ;;  %v2672_v63 = vmul.f32 0.6931472, %v3847_v13  ;;  %3856 = vlog2.f32 %v2618_v21  ;;  %v2612_v27 = vpop.xlane.xlu0 %2611 }
 0x4b5   :  { %v2708_v7 = vsub.f32 %v5071_v37, %v2662_v49  ;;  %3858 = vlog2.f32 %v2612_v27 }
 0x4b6   :  { %v3849_v29 = vpop.eup %3848  ;;  %v2713_v20 = vsub.f32 %v5076_v43, %v2672_v63 }
 0x4b7   :  { %v3851_v45 = vpop.eup %3850  ;;  %2740 = vst [vmem:[#allocation2 + $0x88] sm:$0xff] %v2708_v7  ;;  %v2674_v33 = vmul.f32 0.6931472, %v3849_v29  ;;  %v2614_v25 = vpop.xlane.xlu1 %2613 }
 0x4b8   :  { %2745 = vst [vmem:[#allocation2 + $0xb0] sm:$0xff] %v2713_v20  ;;  %v2668_v57 = vmul.f32 0.6931472, %v3851_v45  ;;  %3860 = vlog2.f32 %v2614_v25 }
 0x4b9   :  { %v2714_v53 = vsub.f32 %v5079_v36, %v2674_v33 }
 0x4ba   :  { %v3853_v17 = vpop.eup %3852  ;;  %v2711_v18 = vsub.f32 %v5084_v1, %v2668_v57 }
 0x4bb   :  { %v3855_v54 = vpop.eup %3854  ;;  %2746 = vst [vmem:[#allocation2 + $0xb8] sm:$0xff] %v2714_v53  ;;  %v2670_v26 = vmul.f32 0.6931472, %v3853_v17  ;;  %v2620_v37 = vpop.xlane.xlu0 %2619 }
 0x4bc   :  { %2743 = vst [vmem:[#allocation2 + $0xa0] sm:$0xff] %v2711_v18  ;;  %v2680_v41 = vmul.f32 0.6931472, %v3855_v54  ;;  %3862 = vlog2.f32 %v2620_v37 }
 0x4bd   :  { %v2712_v43 = vsub.f32 %v5087_v0, %v2670_v26  ;;  %v2622_v6 = vpop.xlane.xlu1 %2621 }
 0x4be   :  { %v3857_v52 = vpop.eup %3856  ;;  %v2717_v51 = vsub.f32 %v5092_v56, %v2680_v41  ;;  %3864 = vlog2.f32 %v2622_v6 }
 0x4bf   :  { %v3859_v40 = vpop.eup %3858  ;;  %2744 = vst [vmem:[#allocation2 + $0xa8] sm:$0xff] %v2712_v43  ;;  %v2682_v36 = vmul.f32 0.6931472, %v3857_v52  ;;  %v2624_v14 = vpop.xlane.xlu0 %2623 }
 0x4c0   :  { %2749 = vst [vmem:[#allocation2 + $0xd0] sm:$0xff] %v2717_v51  ;;  %v2676_v1 = vmul.f32 0.6931472, %v3859_v40  ;;  %3866 = vlog2.f32 %v2624_v14 }
 0x4c1   :  { %v2718_v23 = vsub.f32 %v5095_v5, %v2682_v36  ;;  %v2626_v38 = vpop.xlane.xlu1 %2625 }
 0x4c2   :  { %v3861_v48 = vpop.eup %3860  ;;  %v2715_v60 = vsub.f32 %v5100_v2, %v2676_v1  ;;  %3868 = vlog2.f32 %v2626_v38 }
 0x4c3   :  { %2750 = vst [vmem:[#allocation2 + $0xd8] sm:$0xff] %v2718_v23  ;;  %v2678_v0 = vmul.f32 0.6931472, %v3861_v48 }
 0x4c4   :  { %2747 = vst [vmem:[#allocation2 + $0xc0] sm:$0xff] %v2715_v60 }
 0x4c5   :  { %v2716_v56 = vsub.f32 %v5103_v16, %v2678_v0 }
 0x4c6   :  { %v3863_v47 = vpop.eup %3862 }
 0x4c7   :  { %2748 = vst [vmem:[#allocation2 + $0xc8] sm:$0xff] %v2716_v56  ;;  %v2684_v9 = vmul.f32 0.6931472, %v3863_v47 }
 0x4c8   :  { %v3865_v32 = vpop.eup %3864 }
 0x4c9   :  { %v2719_v46 = vsub.f32 %v5108_v55, %v2684_v9  ;;  %v2686_v35 = vmul.f32 0.6931472, %v3865_v32 }
 0x4ca   :  { %v3867_v39 = vpop.eup %3866 }
 0x4cb   :  { %2751 = vst [vmem:[#allocation2 + $0xe0] sm:$0xff] %v2719_v46  ;;  %v2720_v5 = vsub.f32 %v5112_v42, %v2686_v35  ;;  %v2688_v31 = vmul.f32 0.6931472, %v3867_v39 }
 0x4cc   :  { %v3869_v15 = vpop.eup %3868 }
 0x4cd   :  { %2752 = vst [vmem:[#allocation2 + $0xe8] sm:$0xff] %v2720_v5  ;;  %v2721_v2 = vsub.f32 %v5116_v30, %v2688_v31  ;;  %v2690_v62 = vmul.f32 0.6931472, %v3869_v15 }
 0x4cf   :  { %2753 = vst [vmem:[#allocation2 + $0xf0] sm:$0xff] %v2721_v2  ;;  %v2722_v16 = vsub.f32 %v5120_v4, %v2690_v62 }
 0x4d1   :  { %2754 = vst [vmem:[#allocation2 + $0xf8] sm:$0xff] %v2722_v16 }
 0x4d2   :  { %3881 = shalt.err (!%p3878_p4)
}
 0x4d3   :  { %s3882_s28 = scalar_lea.hbm %s5174_s7, 4096 }
 0x4d4   :  { %p3883_p5 = scmp.ne.s32.totalorder %s5174_s7, %s3882_s28  ;;  %p3886_p6 = scmp.lt.u32.totalorder %s3882_s28, %s5174_s7 }
 0x4d6   :  { %p3888_p7 = pnand %p3886_p6, %p3883_p5 }
 0x4d8   :  { %3891 = shalt.err (!%p3888_p7)
}
 0x4d9   :  { %s3895_s3 = smov 128   ;;  %s3896_s9 = smov 8  }
 0x4da   :  { %2766 = dma.vmem_to_hbm [thread:$0]  %s2761_s25, 4096, %s5174_s7, [#allocation3], %s3895_s3, %s3895_s3, %s3896_s9  }
 0x4db   :  { %3892 = dma.done.wait [#allocation3], 4096  }
 0x4dc   :  { %3893 = vsyncadd [#allocation3], 4294963200 }
 0x4dd   :  { %2770 = vsyncpa [#allocation3], 1 }

</bundles_post_ra>
